<compile_context>
chip_gen: v7x
topology: tpu7x:2x2x1
jax: 0.10.0
libtpu: 0.0.40
codegen_flags: <defaults>
</compile_context>

<pallas_src>
import functools

import jax
import jax.numpy as jnp
from jax.experimental import pallas as pl
from jax.experimental.pallas import tpu as pltpu

INPUT_SIZE = 103
H1, H2, H3 = 128, 256, 128
OUTPUT_SIZE = 16

LANE = 128
SUBLANE = 8
NEG_BIG = -1e30  # bias for padded output lanes -> exp underflows to exactly 0


def _round_up(x, m):
    return ((x + m - 1) // m) * m


def mlp_softmax_kernel(x_ref,
                       w1_ref, b1_ref,
                       w2_ref, b2_ref,
                       w3_ref, b3_ref,
                       w4_ref, b4_ref,
                       o_ref):
    """Fused MLP + softmax on one batch tile.

    Matmuls run on the MXU in the weights' dtype (bf16 or f32) with f32
    accumulation; bias-add / ReLU / softmax stay in f32 on the VPU/EUP.
    """
    cdt = w1_ref.dtype
    approx_recip = (jnp.dtype(cdt) == jnp.dtype(jnp.bfloat16))

    # Layer 1: Linear(128-padded -> 128) + ReLU
    h = jnp.dot(x_ref[...].astype(cdt), w1_ref[...],
                preferred_element_type=jnp.float32)
    h = jnp.maximum(h + b1_ref[...], 0.0)

    # Layer 2: Linear(128 -> 256) + ReLU
    h = jnp.dot(h.astype(cdt), w2_ref[...], preferred_element_type=jnp.float32)
    h = jnp.maximum(h + b2_ref[...], 0.0)

    # Layer 3: Linear(256 -> 128) + ReLU
    h = jnp.dot(h.astype(cdt), w3_ref[...], preferred_element_type=jnp.float32)
    h = jnp.maximum(h + b3_ref[...], 0.0)

    # Layer 4: Linear(128 -> 128-padded output), no activation.
    logits = jnp.dot(h.astype(cdt), w4_ref[...],
                     preferred_element_type=jnp.float32)
    logits = logits + b4_ref[...]           # padded lanes carry bias = -1e30

    # Numerically stable softmax over dim=1; padded lanes become exactly 0.
    m = jnp.max(logits, axis=-1, keepdims=True)
    e = jnp.exp(logits - m)
    denom = jnp.sum(e, axis=-1, keepdims=True)
    o_ref[...] = (e * pl.reciprocal(denom, approx=approx_recip)).astype(o_ref.dtype)


@functools.partial(jax.jit, static_argnames=("batch_tile", "use_bf16"))
def neural_network_forward(x, params, *, batch_tile=256, use_bf16=True):
    """x: (B, ...) castable to float32 (trailing dims are flattened).
    Returns (B, output_size) softmax probabilities in float32."""
    (w1, b1), (w2, b2), (w3, b3), (w4, b4) = params
    out_size = w4.shape[1]

    B = x.shape[0]
    x = x.reshape(B, -1).astype(jnp.float32)        # nn.Flatten(1, -1)
    F = x.shape[1]
    assert F == w1.shape[0]

    # ---- Padding for aligned, lane-dense tiles ------------------------------
    F_pad = _round_up(F, LANE)            # 103 -> 128 : full-K MXU pass
    O_pad = _round_up(out_size, LANE)     # 16  -> 128 : lane-dense output store
    bt = max(SUBLANE, _round_up(batch_tile, SUBLANE))
    B_pad = _round_up(B, bt)              # pad batch instead of asserting B % bt

    x_p = jnp.pad(x, ((0, B_pad - B), (0, F_pad - F)))     # zero rows/cols: harmless
    w1_p = jnp.pad(w1, ((0, F_pad - F), (0, 0)))           # zero rows match x pad
    w4_p = jnp.pad(w4, ((0, 0), (0, O_pad - out_size)))
    b4_p = jnp.pad(b4.reshape(1, -1), ((0, 0), (0, O_pad - out_size)),
                   constant_values=NEG_BIG)

    cdt = jnp.bfloat16 if use_bf16 else jnp.float32
    ws = [w1_p.astype(cdt), w2.astype(cdt), w3.astype(cdt), w4_p.astype(cdt)]
    bs = [b1.reshape(1, -1).astype(jnp.float32),
          b2.reshape(1, -1).astype(jnp.float32),
          b3.reshape(1, -1).astype(jnp.float32),
          b4_p.astype(jnp.float32)]

    # Block-invariant params: keep a single VMEM buffer (no double-buffering).
    def resident(a):
        return pl.BlockSpec(a.shape, lambda i: (0, 0),
                            pipeline_mode=pl.Buffered(1))

    grid = (B_pad // bt,)
    out = pl.pallas_call(
        mlp_softmax_kernel,
        out_shape=jax.ShapeDtypeStruct((B_pad, O_pad), jnp.float32),
        grid_spec=pltpu.PrefetchScalarGridSpec(
            num_scalar_prefetch=0,
            grid=grid,
            in_specs=[
                pl.BlockSpec((bt, F_pad), lambda i: (i, 0)),   # x batch tile
                resident(ws[0]), resident(bs[0]),
                resident(ws[1]), resident(bs[1]),
                resident(ws[2]), resident(bs[2]),
                resident(ws[3]), resident(bs[3]),
            ],
            out_specs=pl.BlockSpec((bt, O_pad), lambda i: (i, 0)),
        ),
        compiler_params=pltpu.CompilerParams(
            dimension_semantics=("parallel",)),   # batch tiles are independent
    )(x_p, ws[0], bs[0], ws[1], bs[1], ws[2], bs[2], ws[3], bs[3])

    return out[:B, :out_size]


def init_params(key, input_size=INPUT_SIZE, output_size=OUTPUT_SIZE):
    """Deterministic synthetic parameters; weights stored as (in, out) so the
    kernel computes x @ W + b (matches PyTorch y = x @ W.T + b)."""
    dims = [(input_size, H1), (H1, H2), (H2, H3), (H3, output_size)]
    params = []
    for din, dout in dims:
        kw, kb, key = jax.random.split(key, 3)
        scale = 1.0 / jnp.sqrt(jnp.float32(din))  # PyTorch-style fan-in uniform
        w = jax.random.uniform(kw, (din, dout), jnp.float32, -scale, scale)
        b = jax.random.uniform(kb, (1, dout), jnp.float32, -scale, scale)
        params.append((w, b))
    return params


if __name__ == "__main__":
    key = jax.random.PRNGKey(0)
    kx, kp = jax.random.split(key)

    B = 200  # matches the module's training batch size; not a multiple of the tile
    x = jax.random.normal(kx, (B, INPUT_SIZE), jnp.float32)
    params = init_params(kp)

    # Pure-JAX f32 reference.
    (w1, b1), (w2, b2), (w3, b3), (w4, b4) = params
    h = jnp.maximum(x @ w1 + b1, 0)
    h = jnp.maximum(h @ w2 + b2, 0)
    h = jnp.maximum(h @ w3 + b3, 0)
    ref = jax.nn.softmax(h @ w4 + b4, axis=1)

    # f32 MXU path: numerically tight.
    out_f32 = jax.block_until_ready(
        neural_network_forward(x, params, batch_tile=256, use_bf16=False))
    assert out_f32.shape == (B, OUTPUT_SIZE)
    assert jnp.allclose(jnp.sum(out_f32, axis=1), 1.0, atol=1e-5)
    assert jnp.allclose(out_f32, ref, atol=1e-5)

    # bf16 MXU path (default, faster): looser tolerance vs. f32 reference.
    out_bf16 = jax.block_until_ready(
        neural_network_forward(x, params, batch_tile=256, use_bf16=True))
    assert out_bf16.shape == (B, OUTPUT_SIZE)
    assert jnp.allclose(jnp.sum(out_bf16, axis=1), 1.0, atol=1e-4)
    assert jnp.allclose(out_bf16, ref, atol=2e-2)

    print("KERNEL_OK")
</pallas_src>

<mosaic_0001>
module attributes {stable_mosaic.version = 11 : i64} {
  func.func @mlp_softmax_kernel(%arg0: i32, %arg1: memref<256x128xf32, #tpu.memory_space<vmem>>, %arg2: memref<128x128xf32, #tpu.memory_space<vmem>>, %arg3: memref<1x128xf32, #tpu.memory_space<vmem>>, %arg4: memref<128x256xf32, #tpu.memory_space<vmem>>, %arg5: memref<1x256xf32, #tpu.memory_space<vmem>>, %arg6: memref<256x128xf32, #tpu.memory_space<vmem>>, %arg7: memref<1x128xf32, #tpu.memory_space<vmem>>, %arg8: memref<128x128xf32, #tpu.memory_space<vmem>>, %arg9: memref<1x128xf32, #tpu.memory_space<vmem>>, %arg10: memref<256x128xf32, #tpu.memory_space<vmem>>) attributes {dimension_semantics = [#tpu.dimension_semantics<parallel>], iteration_bounds = array<i64: 1>, scalar_prefetch = 0 : i64, scratch_operands = 0 : i64, tpu.core_type = #tpu.core_type<tc>, window_params = [{transform_indices = @transform_0, window_bounds = array<i64: 256, 128>}, {pipeline_mode = #tpu.pipeline_mode<synchronous>, transform_indices = @transform_1, window_bounds = array<i64: 128, 128>}, {pipeline_mode = #tpu.pipeline_mode<synchronous>, transform_indices = @transform_2, window_bounds = array<i64: 1, 128>}, {pipeline_mode = #tpu.pipeline_mode<synchronous>, transform_indices = @transform_3, window_bounds = array<i64: 128, 256>}, {pipeline_mode = #tpu.pipeline_mode<synchronous>, transform_indices = @transform_4, window_bounds = array<i64: 1, 256>}, {pipeline_mode = #tpu.pipeline_mode<synchronous>, transform_indices = @transform_5, window_bounds = array<i64: 256, 128>}, {pipeline_mode = #tpu.pipeline_mode<synchronous>, transform_indices = @transform_6, window_bounds = array<i64: 1, 128>}, {pipeline_mode = #tpu.pipeline_mode<synchronous>, transform_indices = @transform_7, window_bounds = array<i64: 128, 128>}, {pipeline_mode = #tpu.pipeline_mode<synchronous>, transform_indices = @transform_8, window_bounds = array<i64: 1, 128>}, {transform_indices = @transform_9, window_bounds = array<i64: 256, 128>}]} {
    %c0 = arith.constant 0 : index
    %c0_0 = arith.constant 0 : index
    %0 = vector.load %arg1[%c0, %c0_0] : memref<256x128xf32, #tpu.memory_space<vmem>>, vector<256x128xf32>
    %c0_1 = arith.constant 0 : index
    %c0_2 = arith.constant 0 : index
    %1 = vector.load %arg2[%c0_1, %c0_2] : memref<128x128xf32, #tpu.memory_space<vmem>>, vector<128x128xf32>
    %cst = arith.constant dense<0.000000e+00> : vector<256x128xf32>
    %2 = tpu.matmul %0, %1, %cst {dimension_numbers = #tpu.dot_dimension_numbers<[1], [0], [0], [1], [0, 0, 1, 1], [], []>} : vector<256x128xf32>, vector<128x128xf32>, vector<256x128xf32> -> vector<256x128xf32>
    %c0_3 = arith.constant 0 : index
    %c0_4 = arith.constant 0 : index
    %3 = vector.load %arg3[%c0_3, %c0_4] : memref<1x128xf32, #tpu.memory_space<vmem>>, vector<1x128xf32>
    %4 = vector.broadcast %3 : vector<1x128xf32> to vector<256x128xf32>
    %5 = arith.addf %2, %4 : vector<256x128xf32>
    %cst_5 = arith.constant 0.000000e+00 : f32
    %6 = vector.broadcast %cst_5 : f32 to vector<256x128xf32>
    %7 = arith.maximumf %5, %6 : vector<256x128xf32>
    %c0_6 = arith.constant 0 : index
    %c0_7 = arith.constant 0 : index
    %8 = vector.load %arg4[%c0_6, %c0_7] : memref<128x256xf32, #tpu.memory_space<vmem>>, vector<128x256xf32>
    %cst_8 = arith.constant dense<0.000000e+00> : vector<256x256xf32>
    %9 = tpu.matmul %7, %8, %cst_8 {dimension_numbers = #tpu.dot_dimension_numbers<[1], [0], [0], [1], [0, 0, 1, 1], [], []>} : vector<256x128xf32>, vector<128x256xf32>, vector<256x256xf32> -> vector<256x256xf32>
    %c0_9 = arith.constant 0 : index
    %c0_10 = arith.constant 0 : index
    %10 = vector.load %arg5[%c0_9, %c0_10] : memref<1x256xf32, #tpu.memory_space<vmem>>, vector<1x256xf32>
    %11 = vector.broadcast %10 : vector<1x256xf32> to vector<256x256xf32>
    %12 = arith.addf %9, %11 : vector<256x256xf32>
    %cst_11 = arith.constant 0.000000e+00 : f32
    %13 = vector.broadcast %cst_11 : f32 to vector<256x256xf32>
    %14 = arith.maximumf %12, %13 : vector<256x256xf32>
    %c0_12 = arith.constant 0 : index
    %c0_13 = arith.constant 0 : index
    %15 = vector.load %arg6[%c0_12, %c0_13] : memref<256x128xf32, #tpu.memory_space<vmem>>, vector<256x128xf32>
    %cst_14 = arith.constant dense<0.000000e+00> : vector<256x128xf32>
    %16 = tpu.matmul %14, %15, %cst_14 {dimension_numbers = #tpu.dot_dimension_numbers<[1], [0], [0], [1], [0, 0, 1, 1], [], []>} : vector<256x256xf32>, vector<256x128xf32>, vector<256x128xf32> -> vector<256x128xf32>
    %c0_15 = arith.constant 0 : index
    %c0_16 = arith.constant 0 : index
    %17 = vector.load %arg7[%c0_15, %c0_16] : memref<1x128xf32, #tpu.memory_space<vmem>>, vector<1x128xf32>
    %18 = vector.broadcast %17 : vector<1x128xf32> to vector<256x128xf32>
    %19 = arith.addf %16, %18 : vector<256x128xf32>
    %cst_17 = arith.constant 0.000000e+00 : f32
    %20 = vector.broadcast %cst_17 : f32 to vector<256x128xf32>
    %21 = arith.maximumf %19, %20 : vector<256x128xf32>
    %c0_18 = arith.constant 0 : index
    %c0_19 = arith.constant 0 : index
    %22 = vector.load %arg8[%c0_18, %c0_19] : memref<128x128xf32, #tpu.memory_space<vmem>>, vector<128x128xf32>
    %cst_20 = arith.constant dense<0.000000e+00> : vector<256x128xf32>
    %23 = tpu.matmul %21, %22, %cst_20 {dimension_numbers = #tpu.dot_dimension_numbers<[1], [0], [0], [1], [0, 0, 1, 1], [], []>} : vector<256x128xf32>, vector<128x128xf32>, vector<256x128xf32> -> vector<256x128xf32>
    %c0_21 = arith.constant 0 : index
    %c0_22 = arith.constant 0 : index
    %24 = vector.load %arg9[%c0_21, %c0_22] : memref<1x128xf32, #tpu.memory_space<vmem>>, vector<1x128xf32>
    %25 = vector.broadcast %24 : vector<1x128xf32> to vector<256x128xf32>
    %26 = arith.addf %23, %25 : vector<256x128xf32>
    %cst_23 = arith.constant dense<0xFF800000> : vector<256xf32>
    %27 = vector.multi_reduction <maximumf>, %26, %cst_23 [1] : vector<256x128xf32> to vector<256xf32>
    %28 = vector.shape_cast %27 : vector<256xf32> to vector<256x1xf32>
    %29 = vector.broadcast %28 : vector<256x1xf32> to vector<256x128xf32>
    %30 = arith.subf %26, %29 : vector<256x128xf32>
    %31 = math.exp %30 : vector<256x128xf32>
    %cst_24 = arith.constant dense<0.000000e+00> : vector<256xf32>
    %32 = vector.multi_reduction <add>, %31, %cst_24 [1] : vector<256x128xf32> to vector<256xf32>
    %33 = vector.shape_cast %32 : vector<256xf32> to vector<256x1xf32>
    %34 = tpu.reciprocal %33 : vector<256x1xf32> -> vector<256x1xf32>
    %35 = vector.broadcast %34 : vector<256x1xf32> to vector<256x128xf32>
    %36 = arith.mulf %31, %35 : vector<256x128xf32>
    %c0_25 = arith.constant 0 : index
    %c0_26 = arith.constant 0 : index
    %37 = vector.load %arg10[%c0_25, %c0_26] : memref<256x128xf32, #tpu.memory_space<vmem>>, vector<256x128xf32>
    tpu.vector_store %arg10[%c0_25, %c0_26], %36 {strides = array<i32>} : memref<256x128xf32, #tpu.memory_space<vmem>>, vector<256x128xf32>,
    return
  }
  func.func @transform_0(%arg0: i32) -> (i32, i32) {
    %c0_i32 = arith.constant 0 : i32
    %c0_i32_0 = arith.constant 0 : i32
    return %arg0, %c0_i32 : i32, i32
  }
  func.func @transform_1(%arg0: i32) -> (i32, i32) {
    %c0_i32 = arith.constant 0 : i32
    %c0_i32_0 = arith.constant 0 : i32
    %c0_i32_1 = arith.constant 0 : i32
    return %c0_i32, %c0_i32_0 : i32, i32
  }
  func.func @transform_2(%arg0: i32) -> (i32, i32) {
    %c0_i32 = arith.constant 0 : i32
    %c0_i32_0 = arith.constant 0 : i32
    %c0_i32_1 = arith.constant 0 : i32
    return %c0_i32, %c0_i32_0 : i32, i32
  }
  func.func @transform_3(%arg0: i32) -> (i32, i32) {
    %c0_i32 = arith.constant 0 : i32
    %c0_i32_0 = arith.constant 0 : i32
    %c0_i32_1 = arith.constant 0 : i32
    return %c0_i32, %c0_i32_0 : i32, i32
  }
  func.func @transform_4(%arg0: i32) -> (i32, i32) {
    %c0_i32 = arith.constant 0 : i32
    %c0_i32_0 = arith.constant 0 : i32
    %c0_i32_1 = arith.constant 0 : i32
    return %c0_i32, %c0_i32_0 : i32, i32
  }
  func.func @transform_5(%arg0: i32) -> (i32, i32) {
    %c0_i32 = arith.constant 0 : i32
    %c0_i32_0 = arith.constant 0 : i32
    %c0_i32_1 = arith.constant 0 : i32
    return %c0_i32, %c0_i32_0 : i32, i32
  }
  func.func @transform_6(%arg0: i32) -> (i32, i32) {
    %c0_i32 = arith.constant 0 : i32
    %c0_i32_0 = arith.constant 0 : i32
    %c0_i32_1 = arith.constant 0 : i32
    return %c0_i32, %c0_i32_0 : i32, i32
  }
  func.func @transform_7(%arg0: i32) -> (i32, i32) {
    %c0_i32 = arith.constant 0 : i32
    %c0_i32_0 = arith.constant 0 : i32
    %c0_i32_1 = arith.constant 0 : i32
    return %c0_i32, %c0_i32_0 : i32, i32
  }
  func.func @transform_8(%arg0: i32) -> (i32, i32) {
    %c0_i32 = arith.constant 0 : i32
    %c0_i32_0 = arith.constant 0 : i32
    %c0_i32_1 = arith.constant 0 : i32
    return %c0_i32, %c0_i32_0 : i32, i32
  }
  func.func @transform_9(%arg0: i32) -> (i32, i32) {
    %c0_i32 = arith.constant 0 : i32
    %c0_i32_0 = arith.constant 0 : i32
    return %arg0, %c0_i32 : i32, i32
  }
}

</mosaic_0001>

<bundles_post_ra>
// kernel: neural_network_forward.1
= control target key start
LH: loop header
LB: loop body
LE: loop exit
PB: predicated region body
PF: predicated region fallthrough
CT: control target
= control target key end

     0   :  { %s3182_s1 = inlined_call_operand.vmem [shape: f32[128,128], index: 1, kind: input, shape index: {}]   ;;  %s3183_s0 = inlined_call_operand.vmem [shape: f32[256,128], index: 0, kind: input, shape index: {}]   ;;  %s3184_s3 = inlined_call_operand.vmem [shape: f32[128,256], index: 3, kind: input, shape index: {}]   ;;  %s3185_s2 = inlined_call_operand.vmem [shape: f32[1,128], index: 2, kind: input, shape index: {}]   ;;  %s3186_s5 = inlined_call_operand.vmem [shape: f32[256,128], index: 5, kind: input, shape index: {}]   ;;  %s3187_s4 = inlined_call_operand.vmem [shape: f32[1,256], index: 4, kind: input, shape index: {}]   ;;  %s3188_s7 = inlined_call_operand.vmem [shape: f32[128,128], index: 7, kind: input, shape index: {}]   ;;  %s3189_s6 = inlined_call_operand.vmem [shape: f32[1,128], index: 6, kind: input, shape index: {}]   ;;  %s3190_s8 = inlined_call_operand.vmem [shape: f32[1,128], index: 8, kind: input, shape index: {}]   ;;  %s3191_s9 = inlined_call_operand.vmem [shape: f32[256,128], index: 9, kind: output, shape index: {}]  }
   0x1   :  { %v64_v0 = vld [vmem:[%s3182_s1] sm:$0xff]  ;;  %v65_v1 = vld [vmem:[%s3182_s1 + $0x8] sm:$0xff]  ;;  %v66_v2 = vld [vmem:[%s3182_s1 + $0x10] sm:$0xff] }
   0x2   :  { %v1836_v3 = vpack.c.bf16 %v65_v1, %v64_v0  ;;  %v67_v4 = vld [vmem:[%s3182_s1 + $0x18] sm:$0xff]  ;;  %v68_v6 = vld [vmem:[%s3182_s1 + $0x20] sm:$0xff]  ;;  %v69_v7 = vld [vmem:[%s3182_s1 + $0x28] sm:$0xff] }
   0x3   :  { %v1840_v5 = vpack.c.bf16 %v67_v4, %v66_v2  ;;  %v1844_v8 = vpack.c.bf16 %v69_v7, %v68_v6  ;;  %v32_v9 = vld [vmem:[%s3183_s0] sm:$0xff]  ;;  %v70_v10 = vld [vmem:[%s3182_s1 + $0x30] sm:$0xff]  ;;  %v71_v11 = vld [vmem:[%s3182_s1 + $0x38] sm:$0xff] }
   0x4   :  { %1837 = vmatprep.subr.bf16.mxu0 %v1836_v3  ;;  %1708 = vmatprep.mubr.f32.mxu0 %v32_v9  ;;  %v1848_v12 = vpack.c.bf16 %v71_v11, %v70_v10  ;;  %v72_v13 = vld [vmem:[%s3182_s1 + $0x40] sm:$0xff]  ;;  %v73_v14 = vld [vmem:[%s3182_s1 + $0x48] sm:$0xff]  ;;  %v74_v16 = vld [vmem:[%s3182_s1 + $0x50] sm:$0xff] }
   0x5   :  { %1839 = vmatpush3.bf16.msra.mxu0 %v1836_v3  ;;  %v1852_v15 = vpack.c.bf16 %v73_v14, %v72_v13  ;;  %v75_v17 = vld [vmem:[%s3182_s1 + $0x58] sm:$0xff]  ;;  %v76_v18 = vld [vmem:[%s3182_s1 + $0x60] sm:$0xff]  ;;  %v77_v19 = vld [vmem:[%s3182_s1 + $0x68] sm:$0xff] }
   0x6   :  { %1841 = vmatprep.subr.bf16.mxu0 %v1840_v5  ;;  %v345_v20 = vld [vmem:[%s3184_s3 + $0x8] sm:$0xff]  ;;  %v347_v21 = vld [vmem:[%s3184_s3 + $0x18] sm:$0xff]  ;;  %v344_v22 = vld [vmem:[%s3184_s3] sm:$0xff]  ;;  %v1856_v23 = vpack.c.bf16 %v75_v17, %v74_v16  ;;  %v1860_v35 = vpack.c.bf16 %v77_v19, %v76_v18 }
   0x7   :  { %v1868_v24 = vpack.c.bf16 %v347_v21, %v345_v20  ;;  %v346_v25 = vld [vmem:[%s3184_s3 + $0x10] sm:$0xff]  ;;  %v349_v26 = vld [vmem:[%s3184_s3 + $0x28] sm:$0xff]  ;;  %v351_v27 = vld [vmem:[%s3184_s3 + $0x38] sm:$0xff] }
   0x8   :  { %v1870_v28 = vpack.c.bf16 %v346_v25, %v344_v22  ;;  %v1872_v29 = vpack.c.bf16 %v351_v27, %v349_v26  ;;  %v348_v30 = vld [vmem:[%s3184_s3 + $0x20] sm:$0xff]  ;;  %v350_v31 = vld [vmem:[%s3184_s3 + $0x30] sm:$0xff]  ;;  %v353_v32 = vld [vmem:[%s3184_s3 + $0x48] sm:$0xff] }
   0x9   :  { %1843 = vmatpush3.bf16.msra.mxu0 %v1840_v5  ;;  %1869 = vmatprep.subr.bf16.mxu1 %v1868_v24  ;;  %v355_v33 = vld [vmem:[%s3184_s3 + $0x58] sm:$0xff]  ;;  %v1874_v34 = vpack.c.bf16 %v350_v31, %v348_v30  ;;  %v78_v36 = vld [vmem:[%s3182_s1 + $0x70] sm:$0xff]  ;;  %v352_v38 = vld [vmem:[%s3184_s3 + $0x40] sm:$0xff] }
   0xa   :  { %1845 = vmatprep.subr.bf16.mxu0 %v1844_v8  ;;  %1871 = vmatpush1.bf16.msra.mxu1 %v1870_v28  ;;  %v1876_v37 = vpack.c.bf16 %v355_v33, %v353_v32  ;;  %v354_v39 = vld [vmem:[%s3184_s3 + $0x50] sm:$0xff]  ;;  %v79_v40 = vld [vmem:[%s3182_s1 + $0x78] sm:$0xff]  ;;  %v357_v41 = vld [vmem:[%s3184_s3 + $0x68] sm:$0xff] }
   0xb   :  { %1873 = vmatprep.subr.bf16.mxu1 %v1872_v29  ;;  %v359_v42 = vld [vmem:[%s3184_s3 + $0x78] sm:$0xff]  ;;  %v1878_v43 = vpack.c.bf16 %v354_v39, %v352_v38  ;;  %v1864_v44 = vpack.c.bf16 %v79_v40, %v78_v36  ;;  %v356_v46 = vld [vmem:[%s3184_s3 + $0x60] sm:$0xff]  ;;  %v358_v47 = vld [vmem:[%s3184_s3 + $0x70] sm:$0xff]  ;;  %v2110_v40 = vmov 0.0  }
   0xc   :  { %v1880_v45 = vpack.c.bf16 %v359_v42, %v357_v41  ;;  %v361_v48 = vld [vmem:[%s3184_s3 + $0x88] sm:$0xff]  ;;  %v363_v49 = vld [vmem:[%s3184_s3 + $0x98] sm:$0xff]  ;;  %v1882_v50 = vpack.c.bf16 %v358_v47, %v356_v46  ;;  %v360_v52 = vld [vmem:[%s3184_s3 + $0x80] sm:$0xff]  ;;  %452 = vmatprep.mubr.f32.mxu1 %v2110_v40 }
   0xd   :  { %1847 = vmatpush3.bf16.msra.mxu0 %v1844_v8  ;;  %v1884_v51 = vpack.c.bf16 %v363_v49, %v361_v48  ;;  %v362_v53 = vld [vmem:[%s3184_s3 + $0x90] sm:$0xff]  ;;  %v365_v54 = vld [vmem:[%s3184_s3 + $0xa8] sm:$0xff]  ;;  %v367_v55 = vld [vmem:[%s3184_s3 + $0xb8] sm:$0xff] }
   0xe   :  { %1849 = vmatprep.subr.bf16.mxu0 %v1848_v12  ;;  %1875 = vmatpush1.bf16.msra.mxu1 %v1874_v34  ;;  %v33_v56 = vld [vmem:[%s3183_s0 + $0x8] sm:$0xff]  ;;  %v1886_v57 = vpack.c.bf16 %v362_v53, %v360_v52  ;;  %v34_v58 = vld [vmem:[%s3183_s0 + $0x10] sm:$0xff]  ;;  %v1888_v59 = vpack.c.bf16 %v367_v55, %v365_v54  ;;  %v364_v60 = vld [vmem:[%s3184_s3 + $0xa0] sm:$0xff] }
   0xf   :  { %1877 = vmatprep.subr.bf16.mxu1 %v1876_v37  ;;  %v366_v61 = vld [vmem:[%s3184_s3 + $0xb0] sm:$0xff]  ;;  %v369_v62 = vld [vmem:[%s3184_s3 + $0xc8] sm:$0xff]  ;;  %v371_v63 = vld [vmem:[%s3184_s3 + $0xd8] sm:$0xff] }
  0x10   :  { %v35_v0 = vld [vmem:[%s3183_s0 + $0x18] sm:$0xff]  ;;  %v1890_v1 = vpack.c.bf16 %v366_v61, %v364_v60  ;;  %v36_v2 = vld [vmem:[%s3183_s0 + $0x20] sm:$0xff]  ;;  %v1892_v3 = vpack.c.bf16 %v371_v63, %v369_v62  ;;  %v370_v5 = vld [vmem:[%s3184_s3 + $0xd0] sm:$0xff] }
  0x11   :  { %1851 = vmatpush3.bf16.msra.mxu0 %v1848_v12  ;;  %v368_v4 = vld [vmem:[%s3184_s3 + $0xc0] sm:$0xff]  ;;  %v37_v6 = vld [vmem:[%s3183_s0 + $0x28] sm:$0xff]  ;;  %v38_v8 = vld [vmem:[%s3183_s0 + $0x30] sm:$0xff] }
  0x12   :  { %1853 = vmatprep.subr.bf16.mxu0 %v1852_v15  ;;  %1879 = vmatpush1.bf16.msra.mxu1 %v1878_v43  ;;  %v1894_v7 = vpack.c.bf16 %v370_v5, %v368_v4  ;;  %v39_v9 = vld [vmem:[%s3183_s0 + $0x38] sm:$0xff]  ;;  %v40_v10 = vld [vmem:[%s3183_s0 + $0x40] sm:$0xff]  ;;  %v41_v11 = vld [vmem:[%s3183_s0 + $0x48] sm:$0xff] }
  0x13   :  { %1881 = vmatprep.subr.bf16.mxu1 %v1880_v45  ;;  %v42_v12 = vld [vmem:[%s3183_s0 + $0x50] sm:$0xff]  ;;  %v43_v13 = vld [vmem:[%s3183_s0 + $0x58] sm:$0xff]  ;;  %v44_v14 = vld [vmem:[%s3183_s0 + $0x60] sm:$0xff]  ;;  %v2111_v45 = vmov 0.0|0.0  }
  0x14   :  { %v46_v16 = vld [vmem:[%s3183_s0 + $0x70] sm:$0xff]  ;;  %v47_v17 = vld [vmem:[%s3183_s0 + $0x78] sm:$0xff]  ;;  %v48_v18 = vld [vmem:[%s3183_s0 + $0x80] sm:$0xff] }
  0x15   :  { %1855 = vmatpush3.bf16.msra.mxu0 %v1852_v15  ;;  %v45_v15 = vld [vmem:[%s3183_s0 + $0x68] sm:$0xff]  ;;  %v50_v20 = vld [vmem:[%s3183_s0 + $0x90] sm:$0xff]  ;;  %v51_v21 = vld [vmem:[%s3183_s0 + $0x98] sm:$0xff] }
  0x16   :  { %1857 = vmatprep.subr.bf16.mxu0 %v1856_v23  ;;  %1883 = vmatpush1.bf16.msra.mxu1 %v1882_v50  ;;  %v49_v19 = vld [vmem:[%s3183_s0 + $0x88] sm:$0xff]  ;;  %v52_v22 = vld [vmem:[%s3183_s0 + $0xa0] sm:$0xff]  ;;  %v54_v24 = vld [vmem:[%s3183_s0 + $0xb0] sm:$0xff] }
  0x17   :  { %1885 = vmatprep.subr.bf16.mxu1 %v1884_v51  ;;  %v55_v25 = vld [vmem:[%s3183_s0 + $0xb8] sm:$0xff]  ;;  %v56_v26 = vld [vmem:[%s3183_s0 + $0xc0] sm:$0xff]  ;;  %v57_v27 = vld [vmem:[%s3183_s0 + $0xc8] sm:$0xff] }
  0x18   :  { %v58_v28 = vld [vmem:[%s3183_s0 + $0xd0] sm:$0xff]  ;;  %v59_v29 = vld [vmem:[%s3183_s0 + $0xd8] sm:$0xff]  ;;  %v60_v30 = vld [vmem:[%s3183_s0 + $0xe0] sm:$0xff] }
  0x19   :  { %1859 = vmatpush3.bf16.msra.mxu0 %v1856_v23  ;;  %v53_v23 = vld [vmem:[%s3183_s0 + $0xa8] sm:$0xff]  ;;  %v62_v32 = vld [vmem:[%s3183_s0 + $0xf0] sm:$0xff]  ;;  %v63_v33 = vld [vmem:[%s3183_s0 + $0xf8] sm:$0xff] }
  0x1a   :  { %1861 = vmatprep.subr.bf16.mxu0 %v1860_v35  ;;  %1887 = vmatpush1.bf16.msra.mxu1 %v1886_v57  ;;  %v61_v31 = vld [vmem:[%s3183_s0 + $0xe8] sm:$0xff]  ;;  %v372_v37 = vld [vmem:[%s3184_s3 + $0xe0] sm:$0xff]  ;;  %v374_v38 = vld [vmem:[%s3184_s3 + $0xf0] sm:$0xff] }
  0x1b   :  { %1889 = vmatprep.subr.bf16.mxu1 %v1888_v59  ;;  %v373_v34 = vld [vmem:[%s3184_s3 + $0xe8] sm:$0xff]  ;;  %v1898_v39 = vpack.c.bf16 %v374_v38, %v372_v37  ;;  %v2406_v41 = vld [vmem:[%s3185_s2] ss:$0 sm:$0xff]  ;;  %v711_v48 = vld [vmem:[%s3186_s5 + $0x10] sm:$0xff] }
  0x1c   :  { %v709_v46 = vld [vmem:[%s3186_s5] sm:$0xff]  ;;  %v710_v47 = vld [vmem:[%s3186_s5 + $0x8] sm:$0xff]  ;;  %v712_v53 = vld [vmem:[%s3186_s5 + $0x18] sm:$0xff] }
  0x1d   :  { %1863 = vmatpush3.bf16.msra.mxu0 %v1860_v35  ;;  %v375_v35 = vld [vmem:[%s3184_s3 + $0xf8] sm:$0xff]  ;;  %v1901_v52 = vpack.c.bf16 %v710_v47, %v709_v46  ;;  %v713_v57 = vld [vmem:[%s3186_s5 + $0x20] sm:$0xff]  ;;  %v727_v47 = vld [vmem:[%s3186_s5 + $0x90] sm:$0xff] }
  0x1e   :  { %1865 = vmatprep.subr.bf16.mxu0 %v1864_v44  ;;  %1891 = vmatpush1.bf16.msra.mxu1 %v1890_v1  ;;  %v1896_v36 = vpack.c.bf16 %v375_v35, %v373_v34  ;;  %v716_v1 = vld [vmem:[%s3186_s5 + $0x38] sm:$0xff]  ;;  %v725_v35 = vld [vmem:[%s3186_s5 + $0x80] sm:$0xff] }
  0x1f   :  { %1893 = vmatprep.subr.bf16.mxu1 %v1892_v3 }
  0x21   :  { %1867 = vmatpush3.bf16.msra.mxu0 %v1864_v44 }
  0x22   :  { %1895 = vmatpush1.bf16.msra.mxu1 %v1894_v7  ;;  %1900 = vmatprep.subr.bf16.mxu0 %v2111_v45  ;;  %v717_v7 = vld [vmem:[%s3186_s5 + $0x40] sm:$0xff] }
  0x23   :  { %1897 = vmatprep.subr.bf16.mxu1 %v1896_v36  ;;  %v726_v36 = vld [vmem:[%s3186_s5 + $0x88] sm:$0xff] }
  0x24   :  { %1709 = vmatmul.mubr.f32.vlgmr.msra.gmra.mrb[0].mxu0 %v33_v56  ;;  %v1904_v56 = vpack.c.bf16 %v712_v53, %v711_v48  ;;  %v1925_v46 = vpack.c.bf16 %v726_v36, %v725_v35  ;;  %v728_v48 = vld [vmem:[%s3186_s5 + $0x98] sm:$0xff] }
  0x25   :  { %1711 = vmatprep.mubr.f32.mxu0 %v34_v58  ;;  %1902 = vmatpush1.bf16.msra.mxu0 %v1901_v52  ;;  %v714_v58 = vld [vmem:[%s3186_s5 + $0x28] sm:$0xff] }
  0x26   :  { %1899 = vmatpush1.bf16.msra.mxu1 %v1898_v39  ;;  %1903 = vmatprep.subr.bf16.mxu0 %v2111_v45  ;;  %v1907_v63 = vpack.c.bf16 %v714_v58, %v713_v57  ;;  %v730_v57 = vld [vmem:[%s3186_s5 + $0xa8] sm:$0xff] }
  0x28   :  { %1712 = vmatmul.mubr.f32.gmra.mrb[2].mxu0 %v35_v0  ;;  %v715_v0 = vld [vmem:[%s3186_s5 + $0x30] sm:$0xff] }
  0x29   :  { %1714 = vmatprep.mubr.f32.mxu0 %v36_v2  ;;  %1905 = vmatpush1.bf16.msra.mxu0 %v1904_v56  ;;  %v729_v56 = vld [vmem:[%s3186_s5 + $0xa0] sm:$0xff] }
  0x2a   :  { %1906 = vmatprep.subr.bf16.mxu0 %v2111_v45 }
  0x2c   :  { %1715 = vmatmul.mubr.f32.gmra.mrb[4].mxu0 %v37_v6  ;;  %v1910_v6 = vpack.c.bf16 %v716_v1, %v715_v0  ;;  %v1931_v0 = vpack.c.bf16 %v730_v57, %v729_v56  ;;  %v731_v1 = vld [vmem:[%s3186_s5 + $0xb0] sm:$0xff] }
  0x2d   :  { %1717 = vmatprep.mubr.f32.mxu0 %v38_v8  ;;  %1908 = vmatpush1.bf16.msra.mxu0 %v1907_v63  ;;  %v718_v8 = vld [vmem:[%s3186_s5 + $0x48] sm:$0xff] }
  0x2e   :  { %1909 = vmatprep.subr.bf16.mxu0 %v2111_v45 }
  0x30   :  { %1718 = vmatmul.mubr.f32.gmra.mrb[6].mxu0 %v39_v9 }
  0x31   :  { %1720 = vmatprep.mubr.f32.mxu0 %v40_v10  ;;  %1911 = vmatpush1.bf16.msra.mxu0 %v1910_v6 }
  0x32   :  { %1912 = vmatprep.subr.bf16.mxu0 %v2111_v45 }
  0x34   :  { %1721 = vmatmul.mubr.f32.gmra.mrb[8].mxu0 %v41_v11 }
  0x35   :  { %1723 = vmatprep.mubr.f32.mxu0 %v42_v12 }
  0x38   :  { %1724 = vmatmul.mubr.f32.gmra.mrb[10].mxu0 %v43_v13  ;;  %v1913_v13 = vpack.c.bf16 %v718_v8, %v717_v7 }
  0x39   :  { %1726 = vmatprep.mubr.f32.mxu0 %v44_v14  ;;  %v719_v14 = vld [vmem:[%s3186_s5 + $0x50] sm:$0xff] }
  0x3a   :  { %1914 = vmatpush1.bf16.msra.mxu0 %v1913_v13 }
  0x3b   :  { %1915 = vmatprep.subr.bf16.mxu0 %v2111_v45 }
  0x3c   :  { %1727 = vmatmul.mubr.f32.gmra.mrb[12].mxu0 %v45_v15  ;;  %v720_v15 = vld [vmem:[%s3186_s5 + $0x58] sm:$0xff] }
  0x3d   :  { %1729 = vmatprep.mubr.f32.mxu0 %v46_v16 }
  0x40   :  { %1730 = vmatmul.mubr.f32.gmra.mrb[14].mxu0 %v47_v17 }
  0x41   :  { %1732 = vmatprep.mubr.f32.mxu0 %v48_v18 }
  0x44   :  { %1733 = vmatmul.mubr.f32.gmra.mrb[16].mxu0 %v49_v19 }
  0x45   :  { %1735 = vmatprep.mubr.f32.mxu0 %v50_v20  ;;  %v1916_v20 = vpack.c.bf16 %v720_v15, %v719_v14 }
  0x47   :  { %1917 = vmatpush1.bf16.msra.mxu0 %v1916_v20  ;;  %v736_v20 = vld [vmem:[%s3186_s5 + $0xd8] sm:$0xff] }
  0x48   :  { %1736 = vmatmul.mubr.f32.gmra.mrb[18].mxu0 %v51_v21  ;;  %v721_v21 = vld [vmem:[%s3186_s5 + $0x60] sm:$0xff]  ;;  %1918 = vmatprep.subr.bf16.mxu0 %v2111_v45 }
  0x49   :  { %1738 = vmatprep.mubr.f32.mxu0 %v52_v22  ;;  %v722_v22 = vld [vmem:[%s3186_s5 + $0x68] sm:$0xff] }
  0x4c   :  { %1739 = vmatmul.mubr.f32.gmra.mrb[20].mxu0 %v53_v23 }
  0x4d   :  { %1741 = vmatprep.mubr.f32.mxu0 %v54_v24 }
  0x50   :  { %1742 = vmatmul.mubr.f32.gmra.mrb[22].mxu0 %v55_v25 }
  0x51   :  { %1744 = vmatprep.mubr.f32.mxu0 %v56_v26 }
  0x54   :  { %1745 = vmatmul.mubr.f32.gmra.mrb[24].mxu0 %v57_v27  ;;  %v1919_v27 = vpack.c.bf16 %v722_v22, %v721_v21 }
  0x55   :  { %1747 = vmatprep.mubr.f32.mxu0 %v58_v28  ;;  %v723_v28 = vld [vmem:[%s3186_s5 + $0x70] sm:$0xff] }
  0x56   :  { %1920 = vmatpush1.bf16.msra.mxu0 %v1919_v27 }
  0x57   :  { %1921 = vmatprep.subr.bf16.mxu0 %v2111_v45 }
  0x58   :  { %1748 = vmatmul.mubr.f32.gmra.mrb[26].mxu0 %v59_v29  ;;  %v724_v29 = vld [vmem:[%s3186_s5 + $0x78] sm:$0xff] }
  0x59   :  { %1750 = vmatprep.mubr.f32.mxu0 %v60_v30  ;;  %v1922_v34 = vpack.c.bf16 %v724_v29, %v723_v28  ;;  %v738_v29 = vld [vmem:[%s3186_s5 + $0xe8] sm:$0xff] }
  0x5b   :  { %1923 = vmatpush1.bf16.msra.mxu0 %v1922_v34 }
  0x5c   :  { %1751 = vmatmul.mubr.f32.gmra.mrb[28].mxu0 %v61_v31  ;;  %1924 = vmatprep.subr.bf16.mxu0 %v2111_v45 }
  0x5d   :  { %1753 = vmatprep.mubr.f32.mxu0 %v62_v32 }
  0x5f   :  { %1926 = vmatpush1.bf16.msra.mxu0 %v1925_v46 }
  0x60   :  { %1754 = vmatmul.mubr.f32.gmra.mrb[30].mxu0 %v63_v33  ;;  %1927 = vmatprep.subr.bf16.mxu0 %v2111_v45 }
  0xf7   :  { %v1710_v42 = vpop.f32.mrb[0].mxu0 }
  0xf8   :  { %v153_v43 = vpop.f32.mrb[1].mxu0  ;;  %v159_v49 = vadd.f32 %v1710_v42, %v2406_v41 }
  0xf9   :  { %v154_v44 = vadd.f32 %v2406_v41, %v153_v43 }
  0xfa   :  { %v313_v59 = vmax.f32 %v159_v49, 0.0 }
  0xfb   :  { %v312_v50 = vmax.f32 %v154_v44, 0.0  ;;  %v1713_v51 = vpop.f32.mrb[2].mxu0 }
  0xfc   :  { %v163_v54 = vpop.f32.mrb[3].mxu0  ;;  %v169_v2 = vadd.f32 %v1713_v51, %v2406_v41 }
  0xfd   :  { %453 = vmatmul.mubr.f32.vlgmr.msra.gmra.mrb[0].mxu1 %v312_v50  ;;  %v164_v55 = vadd.f32 %v2406_v41, %v163_v54 }
  0xfe   :  { %458 = vmatprep.mubr.f32.mxu1 %v2110_v40  ;;  %v315_v9 = vmax.f32 %v169_v2, 0.0  ;;  %v732_v2 = vld [vmem:[%s3186_s5 + $0xb8] sm:$0xff] }
  0xff   :  { %v1716_v60 = vpop.f32.mrb[4].mxu0  ;;  %v314_v62 = vmax.f32 %v164_v55, 0.0  ;;  %v1928_v55 = vpack.c.bf16 %v728_v48, %v727_v47 }
 0x100   :  { %v173_v61 = vpop.f32.mrb[5].mxu0  ;;  %v179_v16 = vadd.f32 %v1716_v60, %v2406_v41 }
 0x101   :  { %459 = vmatmul.mubr.f32.gmra.mrb[2].mxu1 %v313_v59  ;;  %v174_v5 = vadd.f32 %v2406_v41, %v173_v61  ;;  %1929 = vmatpush1.bf16.msra.mxu0 %v1928_v55 }
 0x102   :  { %464 = vmatprep.mubr.f32.mxu1 %v2110_v40  ;;  %v317_v23 = vmax.f32 %v179_v16, 0.0  ;;  %1930 = vmatprep.subr.bf16.mxu0 %v2111_v45 }
 0x103   :  { %v1719_v3 = vpop.f32.mrb[6].mxu0  ;;  %v316_v12 = vmax.f32 %v174_v5, 0.0 }
 0x104   :  { %v183_v4 = vpop.f32.mrb[7].mxu0  ;;  %v189_v30 = vadd.f32 %v1719_v3, %v2406_v41 }
 0x105   :  { %465 = vmatmul.mubr.f32.gmra.mrb[4].mxu1 %v314_v62  ;;  %v184_v19 = vadd.f32 %v2406_v41, %v183_v4  ;;  %1932 = vmatpush1.bf16.msra.mxu0 %v1931_v0 }
 0x106   :  { %470 = vmatprep.mubr.f32.mxu1 %v2110_v40  ;;  %v319_v37 = vmax.f32 %v189_v30, 0.0  ;;  %1933 = vmatprep.subr.bf16.mxu0 %v2111_v45 }
 0x107   :  { %v1722_v10 = vpop.f32.mrb[8].mxu0  ;;  %v318_v26 = vmax.f32 %v184_v19, 0.0  ;;  %v735_v19 = vld [vmem:[%s3186_s5 + $0xd0] sm:$0xff] }
 0x108   :  { %v193_v11 = vpop.f32.mrb[9].mxu0  ;;  %v199_v49 = vadd.f32 %v1722_v10, %v2406_v41  ;;  %v733_v10 = vld [vmem:[%s3186_s5 + $0xc0] sm:$0xff]  ;;  %v1940_v28 = vpack.c.bf16 %v736_v20, %v735_v19 }
 0x109   :  { %471 = vmatmul.mubr.f32.gmra.mrb[6].mxu1 %v315_v9  ;;  %v194_v33 = vadd.f32 %v2406_v41, %v193_v11  ;;  %v1934_v9 = vpack.c.bf16 %v732_v2, %v731_v1  ;;  %v734_v11 = vld [vmem:[%s3186_s5 + $0xc8] sm:$0xff]  ;;  %v376_v2 = vld [vmem:[%s3187_s4] sm:$0x3] }
 0x10a   :  { %476 = vmatprep.mubr.f32.mxu1 %v2110_v40  ;;  %v321_v58 = vmax.f32 %v199_v49, 0.0 }
 0x10b   :  { %v2459_v17 = vpop.f32.mrb[10].mxu0  ;;  %v320_v43 = vmax.f32 %v194_v33, 0.0  ;;  %1935 = vmatpush1.bf16.msra.mxu0 %v1934_v9 }
 0x10c   :  { %v203_v18 = vpop.f32.mrb[11].mxu0  ;;  %v209_v3 = vadd.f32 %v2459_v17, %v2406_v41  ;;  %1936 = vmatprep.subr.bf16.mxu0 %v2111_v45 }
 0x10d   :  { %477 = vmatmul.mubr.f32.gmra.mrb[8].mxu1 %v316_v12  ;;  %v204_v53 = vadd.f32 %v2406_v41, %v203_v18  ;;  %v1937_v18 = vpack.c.bf16 %v734_v11, %v733_v10  ;;  %v1005_v11 = vld [vmem:[%s3188_s7] sm:$0xff] }
 0x10e   :  { %482 = vmatprep.mubr.f32.mxu1 %v2110_v40  ;;  %v323_v12 = vmax.f32 %v209_v3, 0.0 }
 0x10f   :  { %v2470_v24 = vpop.f32.mrb[12].mxu0  ;;  %v322_v62 = vmax.f32 %v204_v53, 0.0  ;;  %1938 = vmatpush1.bf16.msra.mxu0 %v1937_v18  ;;  %v1008_v18 = vld [vmem:[%s3188_s7 + $0x18] sm:$0xff] }
 0x110   :  { %v2472_v25 = vpop.f32.mrb[13].mxu0  ;;  %v219_v21 = vadd.f32 %v2470_v24, %v2406_v41  ;;  %1939 = vmatprep.subr.bf16.mxu0 %v2111_v45  ;;  %v737_v24 = vld [vmem:[%s3186_s5 + $0xe0] sm:$0xff] }
 0x111   :  { %483 = vmatmul.mubr.f32.gmra.mrb[10].mxu1 %v317_v23  ;;  %v214_v7 = vadd.f32 %v2406_v41, %v2472_v25 }
 0x112   :  { %488 = vmatprep.mubr.f32.mxu1 %v2110_v40  ;;  %v325_v30 = vmax.f32 %v219_v21, 0.0  ;;  %v1009_v21 = vld [vmem:[%s3188_s7 + $0x20] sm:$0xff] }
 0x113   :  { %v2483_v31 = vpop.f32.mrb[14].mxu0  ;;  %v324_v16 = vmax.f32 %v214_v7, 0.0  ;;  %1941 = vmatpush1.bf16.msra.mxu0 %v1940_v28 }
 0x114   :  { %v2485_v32 = vpop.f32.mrb[15].mxu0  ;;  %1942 = vmatprep.subr.bf16.mxu0 %v2111_v45 }
 0x115   :  { %489 = vmatmul.mubr.f32.gmra.mrb[12].mxu1 %v318_v26  ;;  %v224_v26 = vadd.f32 %v2406_v41, %v2485_v32 }
 0x116   :  { %494 = vmatprep.mubr.f32.mxu1 %v2110_v40 }
 0x117   :  { %v1734_v38 = vpop.f32.mrb[16].mxu0  ;;  %v326_v35 = vmax.f32 %v224_v26, 0.0 }
 0x118   :  { %v2497_v39 = vadd.f32 %v1734_v38, %v2406_v41  ;;  %v233_v42 = vpop.f32.mrb[17].mxu0  ;;  %v229_v38 = vadd.f32 %v2483_v31, %v2406_v41 }
 0x119   :  { %495 = vmatmul.mubr.f32.gmra.mrb[14].mxu1 %v319_v37  ;;  %v2500_v44 = vadd.f32 %v2406_v41, %v233_v42  ;;  %v1943_v37 = vpack.c.bf16 %v738_v29, %v737_v24 }
 0x11a   :  { %500 = vmatprep.mubr.f32.mxu1 %v2110_v40  ;;  %v327_v48 = vmax.f32 %v229_v38, 0.0  ;;  %v329_v31 = vmax.f32 %v2497_v39, 0.0 }
 0x11b   :  { %v1737_v50 = vpop.f32.mrb[18].mxu0  ;;  %1944 = vmatpush1.bf16.msra.mxu0 %v1943_v37  ;;  %v328_v49 = vmax.f32 %v2500_v44, 0.0 }
 0x11c   :  { %v2512_v51 = vadd.f32 %v1737_v50, %v2406_v41  ;;  %v243_v52 = vpop.f32.mrb[19].mxu0  ;;  %1945 = vmatprep.subr.bf16.mxu0 %v2111_v45 }
 0x11d   :  { %501 = vmatmul.mubr.f32.gmra.mrb[16].mxu1 %v320_v43  ;;  %v2516_v54 = vadd.f32 %v2406_v41, %v243_v52  ;;  %v739_v52 = vld [vmem:[%s3186_s5 + $0xf0] sm:$0xff] }
 0x11e   :  { %506 = vmatprep.mubr.f32.mxu1 %v2110_v40 }
 0x11f   :  { %v1740_v59 = vpop.f32.mrb[20].mxu0  ;;  %v330_v50 = vmax.f32 %v2516_v54, 0.0 }
 0x120   :  { %v2527_v60 = vadd.f32 %v1740_v59, %v2406_v41  ;;  %v253_v61 = vpop.f32.mrb[21].mxu0 }
 0x121   :  { %507 = vmatmul.mubr.f32.gmra.mrb[18].mxu1 %v321_v58  ;;  %v2530_v63 = vadd.f32 %v2406_v41, %v253_v61 }
 0x122   :  { %512 = vmatprep.mubr.f32.mxu1 %v2110_v40  ;;  %v333_v39 = vmax.f32 %v2527_v60, 0.0 }
 0x123   :  { %v1743_v4 = vpop.f32.mrb[22].mxu0  ;;  %v332_v45 = vmax.f32 %v2530_v63, 0.0  ;;  %v378_v63 = vlaneseq }
 0x124   :  { %v2543_v5 = vadd.f32 %v1743_v4, %v2406_v41  ;;  %v263_v6 = vpop.f32.mrb[23].mxu0 }
 0x125   :  { %513 = vmatmul.mubr.f32.gmra.mrb[20].mxu1 %v322_v62  ;;  %v2548_v8 = vadd.f32 %v2406_v41, %v263_v6  ;;  %v379_v0 = vshrl.u32 %v378_v63, 7 }
 0x126   :  { %518 = vmatprep.mubr.f32.mxu1 %v2110_v40  ;;  %v335_v54 = vmax.f32 %v2543_v5, 0.0 }
 0x127   :  { %v1746_v13 = vpop.f32.mrb[24].mxu0  ;;  %v334_v44 = vmax.f32 %v2548_v8, 0.0  ;;  %v380_v1 = vsub.s32 0, %v379_v0  ;;  %v384_v3 = vsub.s32 1, %v379_v0 }
 0x128   :  { %v2559_v14 = vadd.f32 %v1746_v13, %v2406_v41  ;;  %v273_v15 = vpop.f32.mrb[25].mxu0  ;;  %v1007_v13 = vld [vmem:[%s3188_s7 + $0x10] sm:$0xff] }
 0x129   :  { %519 = vmatmul.mubr.f32.gmra.mrb[22].mxu1 %v323_v12  ;;  %v2562_v17 = vadd.f32 %v2406_v41, %v273_v15  ;;  %v2640_v4 = vrot.slane %v376_v2, %v380_v1  ;;  %v2642_v5 = vrot.slane %v376_v2, %v384_v3  ;;  %v1006_v12 = vld [vmem:[%s3188_s7 + $0x8] sm:$0xff]  ;;  %v1952_v20 = vpack.c.bf16 %v1008_v18, %v1007_v13 }
 0x12a   :  { %524 = vmatprep.mubr.f32.mxu1 %v2110_v40  ;;  %v337_v56 = vmax.f32 %v2559_v14, 0.0 }
 0x12b   :  { %v1749_v22 = vpop.f32.mrb[26].mxu0  ;;  %v336_v55 = vmax.f32 %v2562_v17, 0.0  ;;  %v1948_v17 = vpack.c.bf16 %v1006_v12, %v1005_v11 }
 0x12c   :  { %v2575_v23 = vadd.f32 %v1749_v22, %v2406_v41  ;;  %v283_v25 = vpop.f32.mrb[27].mxu0  ;;  %v1010_v22 = vld [vmem:[%s3188_s7 + $0x28] sm:$0xff] }
 0x12d   :  { %525 = vmatmul.mubr.f32.gmra.mrb[24].mxu1 %v324_v16  ;;  %v2580_v27 = vadd.f32 %v2406_v41, %v283_v25  ;;  %1949 = vmatprep.subr.bf16.mxu1 %v1948_v17  ;;  %v1956_v24 = vpack.c.bf16 %v1010_v22, %v1009_v21 }
 0x12e   :  { %530 = vmatprep.mubr.f32.mxu1 %v2110_v40  ;;  %v339_v58 = vmax.f32 %v2575_v23, 0.0  ;;  %1951 = vmatpush3.bf16.msra.mxu1 %v1948_v17 }
 0x12f   :  { %v1752_v33 = vpop.f32.mrb[28].mxu0  ;;  %v338_v57 = vmax.f32 %v2580_v27, 0.0  ;;  %1953 = vmatprep.subr.bf16.mxu1 %v1952_v20 }
 0x130   :  { %v2591_v32 = vadd.f32 %v1752_v33, %v2406_v41  ;;  %v293_v34 = vpop.f32.mrb[29].mxu0  ;;  %v1012_v33 = vld [vmem:[%s3188_s7 + $0x38] sm:$0xff] }
 0x131   :  { %531 = vmatmul.mubr.f32.gmra.mrb[26].mxu1 %v325_v30  ;;  %v294_v36 = vadd.f32 %v2406_v41, %v293_v34  ;;  %v1011_v30 = vld [vmem:[%s3188_s7 + $0x30] sm:$0xff] }
 0x132   :  { %536 = vmatprep.mubr.f32.mxu1 %v2110_v40  ;;  %v341_v60 = vmax.f32 %v2591_v32, 0.0  ;;  %1955 = vmatpush3.bf16.msra.mxu1 %v1952_v20  ;;  %v1960_v38 = vpack.c.bf16 %v1012_v33, %v1011_v30 }
 0x133   :  { %v1755_v42 = vpop.f32.mrb[30].mxu0  ;;  %v340_v59 = vmax.f32 %v294_v36, 0.0  ;;  %1957 = vmatprep.subr.bf16.mxu1 %v1956_v24 }
 0x134   :  { %v309_v43 = vadd.f32 %v1755_v42, %v2406_v41  ;;  %v303_v46 = vpop.f32.mrb[31].mxu0 }
 0x135   :  { %537 = vmatmul.mubr.f32.gmra.mrb[28].mxu1 %v326_v35  ;;  %v304_v47 = vadd.f32 %v2406_v41, %v303_v46  ;;  %v331_v41 = vmax.f32 %v2512_v51, 0.0  ;;  %v740_v51 = vld [vmem:[%s3186_s5 + $0xf8] sm:$0xff]  ;;  %v1014_v46 = vld [vmem:[%s3188_s7 + $0x48] sm:$0xff] }
 0x136   :  { %542 = vmatprep.mubr.f32.mxu1 %v2110_v40  ;;  %v1946_v53 = vpack.c.bf16 %v740_v51, %v739_v52  ;;  %v343_v62 = vmax.f32 %v309_v43, 0.0  ;;  %v1013_v43 = vld [vmem:[%s3188_s7 + $0x40] sm:$0xff]  ;;  %1959 = vmatpush3.bf16.msra.mxu1 %v1956_v24 }
 0x137   :  { %v342_v61 = vmax.f32 %v304_v47, 0.0  ;;  %1961 = vmatprep.subr.bf16.mxu1 %v1960_v38 }
 0x138   :  { %1947 = vmatpush1.bf16.msra.mxu0 %v1946_v53 }
 0x139   :  { %543 = vmatmul.mubr.f32.gmra.mrb[30].mxu1 %v327_v48 }
 0x13a   :  { %548 = vmatprep.mubr.f32.mxu1 %v2110_v40  ;;  %1963 = vmatpush3.bf16.msra.mxu1 %v1960_v38 }
 0x13d   :  { %549 = vmatmul.mubr.f32.gmra.mrb[32].mxu1 %v328_v49 }
 0x13e   :  { %554 = vmatprep.mubr.f32.mxu1 %v2110_v40 }
 0x141   :  { %555 = vmatmul.mubr.f32.gmra.mrb[34].mxu1 %v329_v31 }
 0x142   :  { %560 = vmatprep.mubr.f32.mxu1 %v2110_v40 }
 0x145   :  { %561 = vmatmul.mubr.f32.gmra.mrb[36].mxu1 %v330_v50 }
 0x146   :  { %566 = vmatprep.mubr.f32.mxu1 %v2110_v40 }
 0x149   :  { %567 = vmatmul.mubr.f32.gmra.mrb[38].mxu1 %v331_v41  ;;  %v1964_v41 = vpack.c.bf16 %v1014_v46, %v1013_v43 }
 0x14a   :  { %572 = vmatprep.mubr.f32.mxu1 %v2110_v40 }
 0x14b   :  { %1965 = vmatprep.subr.bf16.mxu1 %v1964_v41 }
 0x14c   :  { %1967 = vmatpush3.bf16.msra.mxu1 %v1964_v41 }
 0x14d   :  { %573 = vmatmul.mubr.f32.gmra.mrb[40].mxu1 %v332_v45 }
 0x14e   :  { %578 = vmatprep.mubr.f32.mxu1 %v2110_v40 }
 0x151   :  { %579 = vmatmul.mubr.f32.gmra.mrb[42].mxu1 %v333_v39  ;;  %v1015_v39 = vld [vmem:[%s3188_s7 + $0x50] sm:$0xff] }
 0x152   :  { %584 = vmatprep.mubr.f32.mxu1 %v2110_v40 }
 0x155   :  { %585 = vmatmul.mubr.f32.gmra.mrb[44].mxu1 %v334_v44  ;;  %v1016_v44 = vld [vmem:[%s3188_s7 + $0x58] sm:$0xff] }
 0x156   :  { %590 = vmatprep.mubr.f32.mxu1 %v2110_v40 }
 0x159   :  { %591 = vmatmul.mubr.f32.gmra.mrb[46].mxu1 %v335_v54 }
 0x15a   :  { %596 = vmatprep.mubr.f32.mxu1 %v2110_v40 }
 0x15d   :  { %597 = vmatmul.mubr.f32.gmra.mrb[48].mxu1 %v336_v55 }
 0x15e   :  { %602 = vmatprep.mubr.f32.mxu1 %v2110_v40 }
 0x161   :  { %603 = vmatmul.mubr.f32.gmra.mrb[50].mxu1 %v337_v56  ;;  %v1968_v56 = vpack.c.bf16 %v1016_v44, %v1015_v39 }
 0x162   :  { %608 = vmatprep.mubr.f32.mxu1 %v2110_v40 }
 0x163   :  { %1969 = vmatprep.subr.bf16.mxu1 %v1968_v56 }
 0x164   :  { %1971 = vmatpush3.bf16.msra.mxu1 %v1968_v56 }
 0x165   :  { %609 = vmatmul.mubr.f32.gmra.mrb[52].mxu1 %v338_v57 }
 0x166   :  { %614 = vmatprep.mubr.f32.mxu1 %v2110_v40 }
 0x169   :  { %615 = vmatmul.mubr.f32.gmra.mrb[54].mxu1 %v339_v58 }
 0x16a   :  { %620 = vmatprep.mubr.f32.mxu1 %v2110_v40 }
 0x16d   :  { %621 = vmatmul.mubr.f32.gmra.mrb[56].mxu1 %v340_v59 }
 0x16e   :  { %626 = vmatprep.mubr.f32.mxu1 %v2110_v40 }
 0x171   :  { %627 = vmatmul.mubr.f32.gmra.mrb[58].mxu1 %v341_v60 }
 0x172   :  { %632 = vmatprep.mubr.f32.mxu1 %v2110_v40 }
 0x175   :  { %633 = vmatmul.mubr.f32.gmra.mrb[60].mxu1 %v342_v61 }
 0x176   :  { %638 = vmatprep.mubr.f32.mxu1 %v2110_v40 }
 0x179   :  { %639 = vmatmul.mubr.f32.gmra.mrb[62].mxu1 %v343_v62 }
 0x1d0   :  { %v454_v6 = vpop.f32.mrb[0].mxu1 }
 0x1d1   :  { %v455_v7 = vadd.f32 %v454_v6, %v2640_v4  ;;  %v456_v8 = vpop.f32.mrb[1].mxu1 }
 0x1d2   :  { %v457_v40 = vadd.f32 %v456_v8, %v2642_v5 }
 0x1d3   :  { %v645_v14 = vmax.f32 %v455_v7, 0.0 }
 0x1d4   :  { %v646_v9 = vmax.f32 %v457_v40, 0.0  ;;  %v460_v10 = vpop.f32.mrb[2].mxu1 }
 0x1d5   :  { %v461_v15 = vadd.f32 %v460_v10, %v2640_v4  ;;  %v462_v16 = vpop.f32.mrb[3].mxu1 }
 0x1d6   :  { %v463_v19 = vadd.f32 %v462_v16, %v2642_v5  ;;  %812 = vmatprep.mubr.f32.mxu0 %v646_v9 }
 0x1d7   :  { %813 = vmatmul.mubr.f32.vlgmr.msra.gmra.mrb[32].mxu0 %v645_v14  ;;  %v647_v26 = vmax.f32 %v461_v15, 0.0 }
 0x1d8   :  { %v648_v23 = vmax.f32 %v463_v19, 0.0  ;;  %v466_v25 = vpop.f32.mrb[4].mxu1 }
 0x1d9   :  { %v467_v27 = vadd.f32 %v466_v25, %v2640_v4  ;;  %v468_v28 = vpop.f32.mrb[5].mxu1 }
 0x1da   :  { %v469_v29 = vadd.f32 %v468_v28, %v2642_v5  ;;  %817 = vmatprep.mubr.f32.mxu0 %v648_v23 }
 0x1db   :  { %818 = vmatmul.mubr.f32.gmra.mrb[34].mxu0 %v647_v26  ;;  %v649_v35 = vmax.f32 %v467_v27, 0.0 }
 0x1dc   :  { %v650_v32 = vmax.f32 %v469_v29, 0.0  ;;  %v472_v34 = vpop.f32.mrb[6].mxu1 }
 0x1dd   :  { %v473_v36 = vadd.f32 %v472_v34, %v2640_v4  ;;  %v474_v37 = vpop.f32.mrb[7].mxu1 }
 0x1de   :  { %v475_v42 = vadd.f32 %v474_v37, %v2642_v5  ;;  %822 = vmatprep.mubr.f32.mxu0 %v650_v32 }
 0x1df   :  { %823 = vmatmul.mubr.f32.gmra.mrb[36].mxu0 %v649_v35  ;;  %v651_v49 = vmax.f32 %v473_v36, 0.0 }
 0x1e0   :  { %v652_v47 = vmax.f32 %v475_v42, 0.0  ;;  %v478_v48 = vpop.f32.mrb[8].mxu1 }
 0x1e1   :  { %v479_v31 = vadd.f32 %v478_v48, %v2640_v4  ;;  %v480_v50 = vpop.f32.mrb[9].mxu1 }
 0x1e2   :  { %v481_v45 = vadd.f32 %v480_v50, %v2642_v5  ;;  %827 = vmatprep.mubr.f32.mxu0 %v652_v47 }
 0x1e3   :  { %828 = vmatmul.mubr.f32.gmra.mrb[38].mxu0 %v651_v49  ;;  %v653_v53 = vmax.f32 %v479_v31, 0.0 }
 0x1e4   :  { %v654_v52 = vmax.f32 %v481_v45, 0.0  ;;  %v484_v51 = vpop.f32.mrb[10].mxu1 }
 0x1e5   :  { %v485_v54 = vadd.f32 %v484_v51, %v2640_v4  ;;  %v486_v55 = vpop.f32.mrb[11].mxu1 }
 0x1e6   :  { %v487_v57 = vadd.f32 %v486_v55, %v2642_v5  ;;  %832 = vmatprep.mubr.f32.mxu0 %v654_v52 }
 0x1e7   :  { %833 = vmatmul.mubr.f32.gmra.mrb[40].mxu0 %v653_v53  ;;  %v655_v60 = vmax.f32 %v485_v54, 0.0 }
 0x1e8   :  { %v656_v58 = vmax.f32 %v487_v57, 0.0  ;;  %v490_v59 = vpop.f32.mrb[12].mxu1 }
 0x1e9   :  { %v491_v61 = vadd.f32 %v490_v59, %v2640_v4  ;;  %v492_v62 = vpop.f32.mrb[13].mxu1 }
 0x1ea   :  { %v493_v63 = vadd.f32 %v492_v62, %v2642_v5  ;;  %837 = vmatprep.mubr.f32.mxu0 %v656_v58 }
 0x1eb   :  { %838 = vmatmul.mubr.f32.gmra.mrb[42].mxu0 %v655_v60  ;;  %v657_v2 = vmax.f32 %v491_v61, 0.0 }
 0x1ec   :  { %v658_v0 = vmax.f32 %v493_v63, 0.0  ;;  %v496_v1 = vpop.f32.mrb[14].mxu1 }
 0x1ed   :  { %v497_v3 = vadd.f32 %v496_v1, %v2640_v4  ;;  %v498_v6 = vpop.f32.mrb[15].mxu1 }
 0x1ee   :  { %v499_v7 = vadd.f32 %v498_v6, %v2642_v5  ;;  %842 = vmatprep.mubr.f32.mxu0 %v658_v0 }
 0x1ef   :  { %843 = vmatmul.mubr.f32.gmra.mrb[44].mxu0 %v657_v2  ;;  %v659_v9 = vmax.f32 %v497_v3, 0.0 }
 0x1f0   :  { %v660_v8 = vmax.f32 %v499_v7, 0.0  ;;  %v502_v40 = vpop.f32.mrb[16].mxu1 }
 0x1f1   :  { %v503_v10 = vadd.f32 %v502_v40, %v2640_v4  ;;  %v504_v11 = vpop.f32.mrb[17].mxu1 }
 0x1f2   :  { %v505_v12 = vadd.f32 %v504_v11, %v2642_v5  ;;  %847 = vmatprep.mubr.f32.mxu0 %v660_v8 }
 0x1f3   :  { %848 = vmatmul.mubr.f32.gmra.mrb[46].mxu0 %v659_v9  ;;  %v661_v15 = vmax.f32 %v503_v10, 0.0 }
 0x1f4   :  { %v662_v13 = vmax.f32 %v505_v12, 0.0  ;;  %v508_v14 = vpop.f32.mrb[18].mxu1 }
 0x1f5   :  { %v509_v16 = vadd.f32 %v508_v14, %v2640_v4  ;;  %v510_v17 = vpop.f32.mrb[19].mxu1 }
 0x1f6   :  { %v511_v18 = vadd.f32 %v510_v17, %v2642_v5  ;;  %852 = vmatprep.mubr.f32.mxu0 %v662_v13 }
 0x1f7   :  { %853 = vmatmul.mubr.f32.gmra.mrb[48].mxu0 %v661_v15  ;;  %v663_v21 = vmax.f32 %v509_v16, 0.0 }
 0x1f8   :  { %v664_v19 = vmax.f32 %v511_v18, 0.0  ;;  %v514_v20 = vpop.f32.mrb[20].mxu1 }
 0x1f9   :  { %v515_v22 = vadd.f32 %v514_v20, %v2640_v4  ;;  %v516_v23 = vpop.f32.mrb[21].mxu1 }
 0x1fa   :  { %v517_v25 = vadd.f32 %v516_v23, %v2642_v5  ;;  %857 = vmatprep.mubr.f32.mxu0 %v664_v19 }
 0x1fb   :  { %858 = vmatmul.mubr.f32.gmra.mrb[50].mxu0 %v663_v21  ;;  %v665_v28 = vmax.f32 %v515_v22, 0.0 }
 0x1fc   :  { %v666_v26 = vmax.f32 %v517_v25, 0.0  ;;  %v520_v27 = vpop.f32.mrb[22].mxu1 }
 0x1fd   :  { %v521_v24 = vadd.f32 %v520_v27, %v2640_v4  ;;  %v522_v29 = vpop.f32.mrb[23].mxu1 }
 0x1fe   :  { %v523_v30 = vadd.f32 %v522_v29, %v2642_v5  ;;  %862 = vmatprep.mubr.f32.mxu0 %v666_v26 }
 0x1ff   :  { %863 = vmatmul.mubr.f32.gmra.mrb[52].mxu0 %v665_v28  ;;  %v667_v34 = vmax.f32 %v521_v24, 0.0 }
 0x200   :  { %v668_v33 = vmax.f32 %v523_v30, 0.0  ;;  %v526_v32 = vpop.f32.mrb[24].mxu1 }
 0x201   :  { %v527_v35 = vadd.f32 %v526_v32, %v2640_v4  ;;  %v528_v36 = vpop.f32.mrb[25].mxu1  ;;  %v1018_v32 = vld [vmem:[%s3188_s7 + $0x68] sm:$0xff] }
 0x202   :  { %v529_v37 = vadd.f32 %v528_v36, %v2642_v5  ;;  %867 = vmatprep.mubr.f32.mxu0 %v668_v33  ;;  %v1017_v33 = vld [vmem:[%s3188_s7 + $0x60] sm:$0xff] }
 0x203   :  { %868 = vmatmul.mubr.f32.gmra.mrb[54].mxu0 %v667_v34  ;;  %v669_v43 = vmax.f32 %v527_v35, 0.0 }
 0x204   :  { %v670_v38 = vmax.f32 %v529_v37, 0.0  ;;  %v532_v42 = vpop.f32.mrb[26].mxu1  ;;  %v1972_v37 = vpack.c.bf16 %v1018_v32, %v1017_v33 }
 0x205   :  { %v533_v46 = vadd.f32 %v532_v42, %v2640_v4  ;;  %v534_v47 = vpop.f32.mrb[27].mxu1 }
 0x206   :  { %v535_v48 = vadd.f32 %v534_v47, %v2642_v5  ;;  %872 = vmatprep.mubr.f32.mxu0 %v670_v38  ;;  %1973 = vmatprep.subr.bf16.mxu1 %v1972_v37  ;;  %v1020_v47 = vld [vmem:[%s3188_s7 + $0x78] sm:$0xff] }
 0x207   :  { %873 = vmatmul.mubr.f32.gmra.mrb[56].mxu0 %v669_v43  ;;  %v671_v50 = vmax.f32 %v533_v46, 0.0  ;;  %1975 = vmatpush3.bf16.msra.mxu1 %v1972_v37  ;;  %v1019_v46 = vld [vmem:[%s3188_s7 + $0x70] sm:$0xff] }
 0x208   :  { %v672_v49 = vmax.f32 %v535_v48, 0.0  ;;  %v538_v31 = vpop.f32.mrb[28].mxu1 }
 0x209   :  { %v539_v41 = vadd.f32 %v538_v31, %v2640_v4  ;;  %v540_v45 = vpop.f32.mrb[29].mxu1 }
 0x20a   :  { %v541_v39 = vadd.f32 %v540_v45, %v2642_v5  ;;  %877 = vmatprep.mubr.f32.mxu0 %v672_v49 }
 0x20b   :  { %878 = vmatmul.mubr.f32.gmra.mrb[58].mxu0 %v671_v50  ;;  %v673_v51 = vmax.f32 %v539_v41, 0.0  ;;  %v1976_v50 = vpack.c.bf16 %v1020_v47, %v1019_v46 }
 0x20c   :  { %v674_v44 = vmax.f32 %v541_v39, 0.0  ;;  %v544_v52 = vpop.f32.mrb[30].mxu1 }
 0x20d   :  { %v545_v53 = vadd.f32 %v544_v52, %v2640_v4  ;;  %v546_v54 = vpop.f32.mrb[31].mxu1  ;;  %1977 = vmatprep.subr.bf16.mxu1 %v1976_v50 }
 0x20e   :  { %v547_v55 = vadd.f32 %v546_v54, %v2642_v5  ;;  %882 = vmatprep.mubr.f32.mxu0 %v674_v44  ;;  %1979 = vmatpush3.bf16.msra.mxu1 %v1976_v50 }
 0x20f   :  { %883 = vmatmul.mubr.f32.gmra.mrb[60].mxu0 %v673_v51  ;;  %v675_v58 = vmax.f32 %v545_v53, 0.0 }
 0x210   :  { %v676_v56 = vmax.f32 %v547_v55, 0.0  ;;  %v550_v57 = vpop.f32.mrb[32].mxu1 }
 0x211   :  { %v551_v59 = vadd.f32 %v550_v57, %v2640_v4  ;;  %v552_v60 = vpop.f32.mrb[33].mxu1 }
 0x212   :  { %v553_v61 = vadd.f32 %v552_v60, %v2642_v5  ;;  %887 = vmatprep.mubr.f32.mxu0 %v676_v56 }
 0x213   :  { %888 = vmatmul.mubr.f32.gmra.mrb[62].mxu0 %v675_v58  ;;  %v677_v0 = vmax.f32 %v551_v59, 0.0 }
 0x214   :  { %v678_v62 = vmax.f32 %v553_v61, 0.0  ;;  %v556_v63 = vpop.f32.mrb[34].mxu1 }
 0x215   :  { %v557_v1 = vadd.f32 %v556_v63, %v2640_v4  ;;  %v558_v2 = vpop.f32.mrb[35].mxu1 }
 0x216   :  { %v559_v3 = vadd.f32 %v558_v2, %v2642_v5  ;;  %892 = vmatprep.mubr.f32.mxu0 %v678_v62 }
 0x217   :  { %893 = vmatmul.mubr.f32.gmra.mrb[64].mxu0 %v677_v0  ;;  %v679_v8 = vmax.f32 %v557_v1, 0.0 }
 0x218   :  { %v680_v6 = vmax.f32 %v559_v3, 0.0  ;;  %v562_v7 = vpop.f32.mrb[36].mxu1 }
 0x219   :  { %v563_v40 = vadd.f32 %v562_v7, %v2640_v4  ;;  %v564_v9 = vpop.f32.mrb[37].mxu1 }
 0x21a   :  { %v565_v10 = vadd.f32 %v564_v9, %v2642_v5  ;;  %897 = vmatprep.mubr.f32.mxu0 %v680_v6 }
 0x21b   :  { %898 = vmatmul.mubr.f32.gmra.mrb[66].mxu0 %v679_v8  ;;  %v681_v13 = vmax.f32 %v563_v40, 0.0 }
 0x21c   :  { %v682_v11 = vmax.f32 %v565_v10, 0.0  ;;  %v568_v12 = vpop.f32.mrb[38].mxu1 }
 0x21d   :  { %v569_v14 = vadd.f32 %v568_v12, %v2640_v4  ;;  %v570_v15 = vpop.f32.mrb[39].mxu1 }
 0x21e   :  { %v571_v16 = vadd.f32 %v570_v15, %v2642_v5  ;;  %902 = vmatprep.mubr.f32.mxu0 %v682_v11 }
 0x21f   :  { %903 = vmatmul.mubr.f32.gmra.mrb[68].mxu0 %v681_v13  ;;  %v683_v19 = vmax.f32 %v569_v14, 0.0 }
 0x220   :  { %v684_v17 = vmax.f32 %v571_v16, 0.0  ;;  %v574_v18 = vpop.f32.mrb[40].mxu1 }
 0x221   :  { %v575_v20 = vadd.f32 %v574_v18, %v2640_v4  ;;  %v576_v21 = vpop.f32.mrb[41].mxu1 }
 0x222   :  { %v577_v22 = vadd.f32 %v576_v21, %v2642_v5  ;;  %907 = vmatprep.mubr.f32.mxu0 %v684_v17 }
 0x223   :  { %908 = vmatmul.mubr.f32.gmra.mrb[70].mxu0 %v683_v19  ;;  %v685_v26 = vmax.f32 %v575_v20, 0.0 }
 0x224   :  { %v686_v23 = vmax.f32 %v577_v22, 0.0  ;;  %v580_v25 = vpop.f32.mrb[42].mxu1 }
 0x225   :  { %v581_v27 = vadd.f32 %v580_v25, %v2640_v4  ;;  %v582_v28 = vpop.f32.mrb[43].mxu1 }
 0x226   :  { %v583_v24 = vadd.f32 %v582_v28, %v2642_v5  ;;  %912 = vmatprep.mubr.f32.mxu0 %v686_v23 }
 0x227   :  { %913 = vmatmul.mubr.f32.gmra.mrb[72].mxu0 %v685_v26  ;;  %v687_v34 = vmax.f32 %v581_v27, 0.0 }
 0x228   :  { %v688_v29 = vmax.f32 %v583_v24, 0.0  ;;  %v586_v30 = vpop.f32.mrb[44].mxu1 }
 0x229   :  { %v587_v35 = vadd.f32 %v586_v30, %v2640_v4  ;;  %v588_v36 = vpop.f32.mrb[45].mxu1 }
 0x22a   :  { %v589_v38 = vadd.f32 %v588_v36, %v2642_v5  ;;  %917 = vmatprep.mubr.f32.mxu0 %v688_v29  ;;  %v2759_v36 = vld [vmem:[%s3189_s6] ss:$0 sm:$0xff] }
 0x22b   :  { %918 = vmatmul.mubr.f32.gmra.mrb[74].mxu0 %v687_v34  ;;  %v689_v48 = vmax.f32 %v587_v35, 0.0 }
 0x22c   :  { %v690_v42 = vmax.f32 %v589_v38, 0.0  ;;  %v592_v43 = vpop.f32.mrb[46].mxu1 }
 0x22d   :  { %v593_v49 = vadd.f32 %v592_v43, %v2640_v4  ;;  %v594_v31 = vpop.f32.mrb[47].mxu1 }
 0x22e   :  { %v595_v41 = vadd.f32 %v594_v31, %v2642_v5  ;;  %922 = vmatprep.mubr.f32.mxu0 %v690_v42 }
 0x22f   :  { %923 = vmatmul.mubr.f32.gmra.mrb[76].mxu0 %v689_v48  ;;  %v691_v44 = vmax.f32 %v593_v49, 0.0 }
 0x230   :  { %v692_v45 = vmax.f32 %v595_v41, 0.0  ;;  %v598_v39 = vpop.f32.mrb[48].mxu1 }
 0x231   :  { %v599_v52 = vadd.f32 %v598_v39, %v2640_v4  ;;  %v600_v51 = vpop.f32.mrb[49].mxu1 }
 0x232   :  { %v601_v53 = vadd.f32 %v600_v51, %v2642_v5  ;;  %927 = vmatprep.mubr.f32.mxu0 %v692_v45 }
 0x233   :  { %928 = vmatmul.mubr.f32.gmra.mrb[78].mxu0 %v691_v44  ;;  %v693_v56 = vmax.f32 %v599_v52, 0.0 }
 0x234   :  { %v694_v54 = vmax.f32 %v601_v53, 0.0  ;;  %v604_v55 = vpop.f32.mrb[50].mxu1 }
 0x235   :  { %v605_v57 = vadd.f32 %v604_v55, %v2640_v4  ;;  %v606_v58 = vpop.f32.mrb[51].mxu1 }
 0x236   :  { %v607_v59 = vadd.f32 %v606_v58, %v2642_v5  ;;  %932 = vmatprep.mubr.f32.mxu0 %v694_v54 }
 0x237   :  { %933 = vmatmul.mubr.f32.gmra.mrb[80].mxu0 %v693_v56  ;;  %v695_v62 = vmax.f32 %v605_v57, 0.0 }
 0x238   :  { %v696_v60 = vmax.f32 %v607_v59, 0.0  ;;  %v610_v61 = vpop.f32.mrb[52].mxu1 }
 0x239   :  { %v611_v63 = vadd.f32 %v610_v61, %v2640_v4  ;;  %v612_v0 = vpop.f32.mrb[53].mxu1 }
 0x23a   :  { %v613_v1 = vadd.f32 %v612_v0, %v2642_v5  ;;  %937 = vmatprep.mubr.f32.mxu0 %v696_v60 }
 0x23b   :  { %938 = vmatmul.mubr.f32.gmra.mrb[82].mxu0 %v695_v62  ;;  %v697_v6 = vmax.f32 %v611_v63, 0.0 }
 0x23c   :  { %v698_v2 = vmax.f32 %v613_v1, 0.0  ;;  %v616_v3 = vpop.f32.mrb[54].mxu1 }
 0x23d   :  { %v617_v7 = vadd.f32 %v616_v3, %v2640_v4  ;;  %v618_v8 = vpop.f32.mrb[55].mxu1 }
 0x23e   :  { %v619_v40 = vadd.f32 %v618_v8, %v2642_v5  ;;  %942 = vmatprep.mubr.f32.mxu0 %v698_v2 }
 0x23f   :  { %943 = vmatmul.mubr.f32.gmra.mrb[84].mxu0 %v697_v6  ;;  %v699_v11 = vmax.f32 %v617_v7, 0.0 }
 0x240   :  { %v700_v9 = vmax.f32 %v619_v40, 0.0  ;;  %v622_v10 = vpop.f32.mrb[56].mxu1 }
 0x241   :  { %v623_v12 = vadd.f32 %v622_v10, %v2640_v4  ;;  %v624_v13 = vpop.f32.mrb[57].mxu1 }
 0x242   :  { %v625_v14 = vadd.f32 %v624_v13, %v2642_v5  ;;  %947 = vmatprep.mubr.f32.mxu0 %v700_v9 }
 0x243   :  { %948 = vmatmul.mubr.f32.gmra.mrb[86].mxu0 %v699_v11  ;;  %v701_v17 = vmax.f32 %v623_v12, 0.0 }
 0x244   :  { %v702_v15 = vmax.f32 %v625_v14, 0.0  ;;  %v628_v16 = vpop.f32.mrb[58].mxu1 }
 0x245   :  { %v629_v18 = vadd.f32 %v628_v16, %v2640_v4  ;;  %v630_v19 = vpop.f32.mrb[59].mxu1 }
 0x246   :  { %v631_v20 = vadd.f32 %v630_v19, %v2642_v5  ;;  %952 = vmatprep.mubr.f32.mxu0 %v702_v15 }
 0x247   :  { %953 = vmatmul.mubr.f32.gmra.mrb[88].mxu0 %v701_v17  ;;  %v703_v23 = vmax.f32 %v629_v18, 0.0 }
 0x248   :  { %v704_v21 = vmax.f32 %v631_v20, 0.0  ;;  %v634_v22 = vpop.f32.mrb[60].mxu1 }
 0x249   :  { %v635_v25 = vadd.f32 %v634_v22, %v2640_v4  ;;  %v636_v26 = vpop.f32.mrb[61].mxu1 }
 0x24a   :  { %v637_v27 = vadd.f32 %v636_v26, %v2642_v5  ;;  %957 = vmatprep.mubr.f32.mxu0 %v704_v21 }
 0x24b   :  { %958 = vmatmul.mubr.f32.gmra.mrb[90].mxu0 %v703_v23  ;;  %v705_v29 = vmax.f32 %v635_v25, 0.0 }
 0x24c   :  { %v706_v28 = vmax.f32 %v637_v27, 0.0  ;;  %v640_v24 = vpop.f32.mrb[62].mxu1 }
 0x24d   :  { %v641_v30 = vadd.f32 %v640_v24, %v2640_v4  ;;  %v642_v33 = vpop.f32.mrb[63].mxu1 }
 0x24e   :  { %v643_v32 = vadd.f32 %v642_v33, %v2642_v5  ;;  %962 = vmatprep.mubr.f32.mxu0 %v706_v28 }
 0x24f   :  { %963 = vmatmul.mubr.f32.gmra.mrb[92].mxu0 %v705_v29  ;;  %v707_v35 = vmax.f32 %v641_v30, 0.0 }
 0x250   :  { %v708_v34 = vmax.f32 %v643_v32, 0.0 }
 0x252   :  { %967 = vmatprep.mubr.f32.mxu0 %v708_v34 }
 0x253   :  { %968 = vmatmul.mubr.f32.gmra.mrb[94].mxu0 %v707_v35 }
 0x2aa   :  { %v814_v37 = vpop.f32.mrb[32].mxu0 }
 0x2ab   :  { %v815_v38 = vadd.f32 %v2759_v36, %v814_v37  ;;  %v816_v42 = vpop.f32.mrb[33].mxu0 }
 0x2ad   :  { %v973_v43 = vmax.f32 %v815_v38, 0.0 }
 0x2ae   :  { %v819_v4 = vpop.f32.mrb[34].mxu0 }
 0x2af   :  { %v820_v46 = vadd.f32 %v2759_v36, %v819_v4  ;;  %v821_v5 = vpop.f32.mrb[35].mxu0  ;;  %1788 = vmatprep.mubr.f32.mxu1 %v973_v43 }
 0x2b1   :  { %v974_v47 = vmax.f32 %v820_v46, 0.0 }
 0x2b2   :  { %v824_v48 = vpop.f32.mrb[36].mxu0 }
 0x2b3   :  { %v825_v49 = vadd.f32 %v2759_v36, %v824_v48  ;;  %v826_v31 = vpop.f32.mrb[37].mxu0  ;;  %1789 = vmatmul.mubr.f32.vlgmr.msra.gmra.mrb[64].mxu1 %v974_v47 }
 0x2b5   :  { %v975_v50 = vmax.f32 %v825_v49, 0.0 }
 0x2b6   :  { %v829_v41 = vpop.f32.mrb[38].mxu0 }
 0x2b7   :  { %v830_v45 = vadd.f32 %v2759_v36, %v829_v41  ;;  %v831_v39 = vpop.f32.mrb[39].mxu0  ;;  %1791 = vmatprep.mubr.f32.mxu1 %v975_v50 }
 0x2b9   :  { %v976_v44 = vmax.f32 %v830_v45, 0.0 }
 0x2ba   :  { %v834_v52 = vpop.f32.mrb[40].mxu0 }
 0x2bb   :  { %v835_v51 = vadd.f32 %v2759_v36, %v834_v52  ;;  %v836_v53 = vpop.f32.mrb[41].mxu0  ;;  %1792 = vmatmul.mubr.f32.gmra.mrb[66].mxu1 %v976_v44 }
 0x2bd   :  { %v977_v54 = vmax.f32 %v835_v51, 0.0 }
 0x2be   :  { %v839_v55 = vpop.f32.mrb[42].mxu0 }
 0x2bf   :  { %v840_v56 = vadd.f32 %v2759_v36, %v839_v55  ;;  %v841_v57 = vpop.f32.mrb[43].mxu0  ;;  %1794 = vmatprep.mubr.f32.mxu1 %v977_v54 }
 0x2c1   :  { %v978_v58 = vmax.f32 %v840_v56, 0.0 }
 0x2c2   :  { %v844_v59 = vpop.f32.mrb[44].mxu0 }
 0x2c3   :  { %v845_v60 = vadd.f32 %v2759_v36, %v844_v59  ;;  %v846_v61 = vpop.f32.mrb[45].mxu0  ;;  %1795 = vmatmul.mubr.f32.gmra.mrb[68].mxu1 %v978_v58 }
 0x2c5   :  { %v979_v62 = vmax.f32 %v845_v60, 0.0 }
 0x2c6   :  { %v849_v63 = vpop.f32.mrb[46].mxu0 }
 0x2c7   :  { %v850_v0 = vadd.f32 %v2759_v36, %v849_v63  ;;  %v851_v1 = vpop.f32.mrb[47].mxu0  ;;  %1797 = vmatprep.mubr.f32.mxu1 %v979_v62 }
 0x2c9   :  { %v980_v2 = vmax.f32 %v850_v0, 0.0 }
 0x2ca   :  { %v854_v3 = vpop.f32.mrb[48].mxu0 }
 0x2cb   :  { %v855_v6 = vadd.f32 %v2759_v36, %v854_v3  ;;  %v856_v7 = vpop.f32.mrb[49].mxu0  ;;  %1798 = vmatmul.mubr.f32.gmra.mrb[70].mxu1 %v980_v2 }
 0x2cd   :  { %v981_v8 = vmax.f32 %v855_v6, 0.0 }
 0x2ce   :  { %v859_v40 = vpop.f32.mrb[50].mxu0 }
 0x2cf   :  { %v860_v9 = vadd.f32 %v2759_v36, %v859_v40  ;;  %v861_v10 = vpop.f32.mrb[51].mxu0  ;;  %1800 = vmatprep.mubr.f32.mxu1 %v981_v8 }
 0x2d1   :  { %v982_v11 = vmax.f32 %v860_v9, 0.0 }
 0x2d2   :  { %v864_v12 = vpop.f32.mrb[52].mxu0 }
 0x2d3   :  { %v865_v13 = vadd.f32 %v2759_v36, %v864_v12  ;;  %v866_v14 = vpop.f32.mrb[53].mxu0  ;;  %1801 = vmatmul.mubr.f32.gmra.mrb[72].mxu1 %v982_v11 }
 0x2d5   :  { %v983_v15 = vmax.f32 %v865_v13, 0.0 }
 0x2d6   :  { %v869_v16 = vpop.f32.mrb[54].mxu0 }
 0x2d7   :  { %v870_v17 = vadd.f32 %v2759_v36, %v869_v16  ;;  %v871_v18 = vpop.f32.mrb[55].mxu0  ;;  %1803 = vmatprep.mubr.f32.mxu1 %v983_v15 }
 0x2d9   :  { %v984_v19 = vmax.f32 %v870_v17, 0.0 }
 0x2da   :  { %v874_v20 = vpop.f32.mrb[56].mxu0 }
 0x2db   :  { %v875_v21 = vadd.f32 %v2759_v36, %v874_v20  ;;  %v876_v22 = vpop.f32.mrb[57].mxu0  ;;  %1804 = vmatmul.mubr.f32.gmra.mrb[74].mxu1 %v984_v19 }
 0x2dd   :  { %v985_v23 = vmax.f32 %v875_v21, 0.0 }
 0x2de   :  { %v879_v25 = vpop.f32.mrb[58].mxu0 }
 0x2df   :  { %v880_v26 = vadd.f32 %v2759_v36, %v879_v25  ;;  %v881_v27 = vpop.f32.mrb[59].mxu0  ;;  %1806 = vmatprep.mubr.f32.mxu1 %v985_v23 }
 0x2e1   :  { %v986_v28 = vmax.f32 %v880_v26, 0.0 }
 0x2e2   :  { %v884_v24 = vpop.f32.mrb[60].mxu0 }
 0x2e3   :  { %v885_v29 = vadd.f32 %v2759_v36, %v884_v24  ;;  %v886_v30 = vpop.f32.mrb[61].mxu0  ;;  %1807 = vmatmul.mubr.f32.gmra.mrb[76].mxu1 %v986_v28 }
 0x2e5   :  { %v987_v33 = vmax.f32 %v885_v29, 0.0 }
 0x2e6   :  { %v889_v32 = vpop.f32.mrb[62].mxu0 }
 0x2e7   :  { %v890_v34 = vadd.f32 %v2759_v36, %v889_v32  ;;  %v891_v35 = vpop.f32.mrb[63].mxu0  ;;  %1809 = vmatprep.mubr.f32.mxu1 %v987_v33 }
 0x2e9   :  { %v988_v37 = vmax.f32 %v890_v34, 0.0 }
 0x2ea   :  { %v894_v38 = vpop.f32.mrb[64].mxu0 }
 0x2eb   :  { %v895_v42 = vadd.f32 %v2759_v36, %v894_v38  ;;  %v896_v43 = vpop.f32.mrb[65].mxu0  ;;  %1810 = vmatmul.mubr.f32.gmra.mrb[78].mxu1 %v988_v37 }
 0x2ed   :  { %v989_v4 = vmax.f32 %v895_v42, 0.0  ;;  %v2796_v42 = vld [vmem:[%s3190_s8] ss:$0 sm:$0xff] }
 0x2ee   :  { %v899_v46 = vpop.f32.mrb[66].mxu0 }
 0x2ef   :  { %v900_v5 = vadd.f32 %v2759_v36, %v899_v46  ;;  %v901_v47 = vpop.f32.mrb[67].mxu0  ;;  %1812 = vmatprep.mubr.f32.mxu1 %v989_v4 }
 0x2f1   :  { %v990_v48 = vmax.f32 %v900_v5, 0.0 }
 0x2f2   :  { %v904_v49 = vpop.f32.mrb[68].mxu0 }
 0x2f3   :  { %v905_v31 = vadd.f32 %v2759_v36, %v904_v49  ;;  %v906_v50 = vpop.f32.mrb[69].mxu0  ;;  %1813 = vmatmul.mubr.f32.gmra.mrb[80].mxu1 %v990_v48 }
 0x2f5   :  { %v991_v41 = vmax.f32 %v905_v31, 0.0 }
 0x2f6   :  { %v909_v45 = vpop.f32.mrb[70].mxu0 }
 0x2f7   :  { %v910_v39 = vadd.f32 %v2759_v36, %v909_v45  ;;  %v911_v44 = vpop.f32.mrb[71].mxu0  ;;  %1815 = vmatprep.mubr.f32.mxu1 %v991_v41 }
 0x2f9   :  { %v992_v52 = vmax.f32 %v910_v39, 0.0 }
 0x2fa   :  { %v914_v51 = vpop.f32.mrb[72].mxu0 }
 0x2fb   :  { %v915_v53 = vadd.f32 %v2759_v36, %v914_v51  ;;  %v916_v54 = vpop.f32.mrb[73].mxu0  ;;  %1816 = vmatmul.mubr.f32.gmra.mrb[82].mxu1 %v992_v52 }
 0x2fd   :  { %v993_v55 = vmax.f32 %v915_v53, 0.0 }
 0x2fe   :  { %v919_v56 = vpop.f32.mrb[74].mxu0 }
 0x2ff   :  { %v920_v57 = vadd.f32 %v2759_v36, %v919_v56  ;;  %v921_v58 = vpop.f32.mrb[75].mxu0  ;;  %1818 = vmatprep.mubr.f32.mxu1 %v993_v55 }
 0x301   :  { %v994_v59 = vmax.f32 %v920_v57, 0.0 }
 0x302   :  { %v924_v60 = vpop.f32.mrb[76].mxu0 }
 0x303   :  { %v925_v61 = vadd.f32 %v2759_v36, %v924_v60  ;;  %v926_v62 = vpop.f32.mrb[77].mxu0  ;;  %1819 = vmatmul.mubr.f32.gmra.mrb[84].mxu1 %v994_v59 }
 0x305   :  { %v995_v63 = vmax.f32 %v925_v61, 0.0 }
 0x306   :  { %v929_v0 = vpop.f32.mrb[78].mxu0 }
 0x307   :  { %v930_v1 = vadd.f32 %v2759_v36, %v929_v0  ;;  %v931_v2 = vpop.f32.mrb[79].mxu0  ;;  %1821 = vmatprep.mubr.f32.mxu1 %v995_v63 }
 0x309   :  { %v996_v3 = vmax.f32 %v930_v1, 0.0 }
 0x30a   :  { %v934_v6 = vpop.f32.mrb[80].mxu0 }
 0x30b   :  { %v935_v7 = vadd.f32 %v2759_v36, %v934_v6  ;;  %v936_v8 = vpop.f32.mrb[81].mxu0  ;;  %1822 = vmatmul.mubr.f32.gmra.mrb[86].mxu1 %v996_v3 }
 0x30d   :  { %v997_v40 = vmax.f32 %v935_v7, 0.0 }
 0x30e   :  { %v939_v9 = vpop.f32.mrb[82].mxu0 }
 0x30f   :  { %v940_v10 = vadd.f32 %v2759_v36, %v939_v9  ;;  %v941_v11 = vpop.f32.mrb[83].mxu0  ;;  %1824 = vmatprep.mubr.f32.mxu1 %v997_v40 }
 0x311   :  { %v998_v12 = vmax.f32 %v940_v10, 0.0 }
 0x312   :  { %v944_v13 = vpop.f32.mrb[84].mxu0 }
 0x313   :  { %v945_v14 = vadd.f32 %v2759_v36, %v944_v13  ;;  %v946_v15 = vpop.f32.mrb[85].mxu0  ;;  %1825 = vmatmul.mubr.f32.gmra.mrb[88].mxu1 %v998_v12 }
 0x315   :  { %v999_v16 = vmax.f32 %v945_v14, 0.0 }
 0x316   :  { %v949_v17 = vpop.f32.mrb[86].mxu0 }
 0x317   :  { %v950_v18 = vadd.f32 %v2759_v36, %v949_v17  ;;  %v951_v19 = vpop.f32.mrb[87].mxu0  ;;  %1827 = vmatprep.mubr.f32.mxu1 %v999_v16 }
 0x319   :  { %v1000_v20 = vmax.f32 %v950_v18, 0.0 }
 0x31a   :  { %v954_v21 = vpop.f32.mrb[88].mxu0 }
 0x31b   :  { %v955_v22 = vadd.f32 %v2759_v36, %v954_v21  ;;  %v956_v23 = vpop.f32.mrb[89].mxu0  ;;  %1828 = vmatmul.mubr.f32.gmra.mrb[90].mxu1 %v1000_v20 }
 0x31d   :  { %v1001_v25 = vmax.f32 %v955_v22, 0.0 }
 0x31e   :  { %v959_v26 = vpop.f32.mrb[90].mxu0 }
 0x31f   :  { %v960_v27 = vadd.f32 %v2759_v36, %v959_v26  ;;  %v961_v28 = vpop.f32.mrb[91].mxu0  ;;  %1830 = vmatprep.mubr.f32.mxu1 %v1001_v25 }
 0x321   :  { %v1002_v24 = vmax.f32 %v960_v27, 0.0 }
 0x322   :  { %v964_v29 = vpop.f32.mrb[92].mxu0 }
 0x323   :  { %v965_v30 = vadd.f32 %v2759_v36, %v964_v29  ;;  %v966_v33 = vpop.f32.mrb[93].mxu0  ;;  %1831 = vmatmul.mubr.f32.gmra.mrb[92].mxu1 %v1002_v24 }
 0x325   :  { %v1003_v32 = vmax.f32 %v965_v30, 0.0 }
 0x326   :  { %v969_v34 = vpop.f32.mrb[94].mxu0 }
 0x327   :  { %v970_v35 = vadd.f32 %v2759_v36, %v969_v34  ;;  %v971_v37 = vpop.f32.mrb[95].mxu0  ;;  %1833 = vmatprep.mubr.f32.mxu1 %v1003_v32 }
 0x329   :  { %v1004_v38 = vmax.f32 %v970_v35, 0.0 }
 0x32b   :  { %1834 = vmatmul.mubr.f32.gmra.mrb[94].mxu1 %v1004_v38 }
 0x386   :  { %v1790_v43 = vpop.f32.mrb[64].mxu1 }
 0x387   :  { %v2799_v4 = vadd.f32 %v1790_v43, %v2796_v42  ;;  %v1094_v46 = vpop.f32.mrb[65].mxu1 }
 0x388   :  { %v2803_v5 = vadd.f32 %v2796_v42, %v1094_v46 }
 0x389   :  { %1255 = vmax.xlane.f32.xlu0 %v2799_v4 }
 0x38d   :  { %1253 = vmax.xlane.f32.xlu0 %v2803_v5 }
 0x38e   :  { %v1793_v36 = vpop.f32.mrb[66].mxu1 }
 0x38f   :  { %v2807_v47 = vadd.f32 %v1793_v36, %v2796_v42  ;;  %v1104_v48 = vpop.f32.mrb[67].mxu1 }
 0x390   :  { %v2811_v49 = vadd.f32 %v2796_v42, %v1104_v48 }
 0x391   :  { %1259 = vmax.xlane.f32.xlu1 %v2807_v47 }
 0x395   :  { %1257 = vmax.xlane.f32.xlu1 %v2811_v49 }
 0x396   :  { %v1796_v31 = vpop.f32.mrb[68].mxu1 }
 0x397   :  { %v2815_v50 = vadd.f32 %v1796_v31, %v2796_v42  ;;  %v1114_v41 = vpop.f32.mrb[69].mxu1 }
 0x398   :  { %v2818_v45 = vadd.f32 %v2796_v42, %v1114_v41 }
 0x399   :  { %1263 = vmax.xlane.f32.xlu1 %v2815_v50 }
 0x39a   :  { %1261 = vmax.xlane.f32.xlu0 %v2818_v45 }
 0x39e   :  { %v1799_v39 = vpop.f32.mrb[70].mxu1 }
 0x39f   :  { %v2823_v44 = vadd.f32 %v1799_v39, %v2796_v42  ;;  %v1124_v52 = vpop.f32.mrb[71].mxu1 }
 0x3a0   :  { %v2826_v51 = vadd.f32 %v2796_v42, %v1124_v52 }
 0x3a1   :  { %1267 = vmax.xlane.f32.xlu1 %v2823_v44 }
 0x3a2   :  { %1265 = vmax.xlane.f32.xlu0 %v2826_v51 }
 0x3a6   :  { %v1802_v53 = vpop.f32.mrb[72].mxu1 }
 0x3a7   :  { %v2831_v54 = vadd.f32 %v1802_v53, %v2796_v42  ;;  %v1134_v55 = vpop.f32.mrb[73].mxu1 }
 0x3a8   :  { %v2834_v56 = vadd.f32 %v2796_v42, %v1134_v55 }
 0x3a9   :  { %1271 = vmax.xlane.f32.xlu1 %v2831_v54 }
 0x3aa   :  { %1269 = vmax.xlane.f32.xlu0 %v2834_v56 }
 0x3ae   :  { %v1805_v57 = vpop.f32.mrb[74].mxu1 }
 0x3af   :  { %v2839_v58 = vadd.f32 %v1805_v57, %v2796_v42  ;;  %v1144_v59 = vpop.f32.mrb[75].mxu1 }
 0x3b0   :  { %v2842_v60 = vadd.f32 %v2796_v42, %v1144_v59 }
 0x3b1   :  { %1275 = vmax.xlane.f32.xlu1 %v2839_v58 }
 0x3b2   :  { %1273 = vmax.xlane.f32.xlu0 %v2842_v60 }
 0x3b6   :  { %v1808_v61 = vpop.f32.mrb[76].mxu1 }
 0x3b7   :  { %v2847_v62 = vadd.f32 %v1808_v61, %v2796_v42  ;;  %v1154_v63 = vpop.f32.mrb[77].mxu1 }
 0x3b8   :  { %v2850_v0 = vadd.f32 %v2796_v42, %v1154_v63 }
 0x3b9   :  { %1279 = vmax.xlane.f32.xlu1 %v2847_v62 }
 0x3ba   :  { %1277 = vmax.xlane.f32.xlu0 %v2850_v0 }
 0x3be   :  { %v1811_v1 = vpop.f32.mrb[78].mxu1 }
 0x3bf   :  { %v2855_v2 = vadd.f32 %v1811_v1, %v2796_v42  ;;  %v1164_v3 = vpop.f32.mrb[79].mxu1 }
 0x3c0   :  { %v2858_v6 = vadd.f32 %v2796_v42, %v1164_v3 }
 0x3c1   :  { %1283 = vmax.xlane.f32.xlu1 %v2855_v2 }
 0x3c2   :  { %1281 = vmax.xlane.f32.xlu0 %v2858_v6 }
 0x3c6   :  { %v1814_v7 = vpop.f32.mrb[80].mxu1 }
 0x3c7   :  { %v2863_v8 = vadd.f32 %v1814_v7, %v2796_v42  ;;  %v1174_v40 = vpop.f32.mrb[81].mxu1 }
 0x3c8   :  { %v2866_v9 = vadd.f32 %v2796_v42, %v1174_v40 }
 0x3c9   :  { %1287 = vmax.xlane.f32.xlu1 %v2863_v8 }
 0x3ca   :  { %1285 = vmax.xlane.f32.xlu0 %v2866_v9 }
 0x3ce   :  { %v1817_v10 = vpop.f32.mrb[82].mxu1 }
 0x3cf   :  { %v2871_v11 = vadd.f32 %v1817_v10, %v2796_v42  ;;  %v1184_v12 = vpop.f32.mrb[83].mxu1 }
 0x3d0   :  { %v2874_v13 = vadd.f32 %v2796_v42, %v1184_v12 }
 0x3d1   :  { %1291 = vmax.xlane.f32.xlu1 %v2871_v11 }
 0x3d2   :  { %1289 = vmax.xlane.f32.xlu0 %v2874_v13 }
 0x3d6   :  { %v1820_v14 = vpop.f32.mrb[84].mxu1 }
 0x3d7   :  { %v2879_v15 = vadd.f32 %v1820_v14, %v2796_v42  ;;  %v1194_v16 = vpop.f32.mrb[85].mxu1 }
 0x3d8   :  { %v2882_v17 = vadd.f32 %v2796_v42, %v1194_v16 }
 0x3d9   :  { %1295 = vmax.xlane.f32.xlu1 %v2879_v15 }
 0x3da   :  { %1293 = vmax.xlane.f32.xlu0 %v2882_v17 }
 0x3de   :  { %v1823_v18 = vpop.f32.mrb[86].mxu1 }
 0x3df   :  { %v2887_v19 = vadd.f32 %v1823_v18, %v2796_v42  ;;  %v1204_v20 = vpop.f32.mrb[87].mxu1 }
 0x3e0   :  { %v2890_v21 = vadd.f32 %v2796_v42, %v1204_v20 }
 0x3e1   :  { %1299 = vmax.xlane.f32.xlu1 %v2887_v19 }
 0x3e2   :  { %1297 = vmax.xlane.f32.xlu0 %v2890_v21 }
 0x3e6   :  { %v1826_v22 = vpop.f32.mrb[88].mxu1 }
 0x3e7   :  { %v2895_v23 = vadd.f32 %v1826_v22, %v2796_v42  ;;  %v1214_v25 = vpop.f32.mrb[89].mxu1 }
 0x3e8   :  { %v2898_v26 = vadd.f32 %v2796_v42, %v1214_v25 }
 0x3e9   :  { %1303 = vmax.xlane.f32.xlu1 %v2895_v23 }
 0x3ea   :  { %1301 = vmax.xlane.f32.xlu0 %v2898_v26 }
 0x3ee   :  { %v1829_v27 = vpop.f32.mrb[90].mxu1 }
 0x3ef   :  { %v2903_v28 = vadd.f32 %v1829_v27, %v2796_v42  ;;  %v1224_v24 = vpop.f32.mrb[91].mxu1 }
 0x3f0   :  { %v2906_v29 = vadd.f32 %v2796_v42, %v1224_v24 }
 0x3f1   :  { %1307 = vmax.xlane.f32.xlu1 %v2903_v28 }
 0x3f2   :  { %1305 = vmax.xlane.f32.xlu0 %v2906_v29 }
 0x3f6   :  { %v1832_v30 = vpop.f32.mrb[92].mxu1 }
 0x3f7   :  { %v2911_v33 = vadd.f32 %v1832_v30, %v2796_v42  ;;  %v1234_v32 = vpop.f32.mrb[93].mxu1 }
 0x3f8   :  { %v2914_v34 = vadd.f32 %v2796_v42, %v1234_v32 }
 0x3f9   :  { %1311 = vmax.xlane.f32.xlu1 %v2911_v33 }
 0x3fa   :  { %1309 = vmax.xlane.f32.xlu0 %v2914_v34 }
 0x3fe   :  { %v1835_v35 = vpop.f32.mrb[94].mxu1 }
 0x3ff   :  { %v2919_v37 = vadd.f32 %v1835_v35, %v2796_v42  ;;  %v1244_v38 = vpop.f32.mrb[95].mxu1 }
 0x400   :  { %v2922_v43 = vadd.f32 %v2796_v42, %v1244_v38 }
 0x401   :  { %1315 = vmax.xlane.f32.xlu1 %v2919_v37 }
 0x402   :  { %1313 = vmax.xlane.f32.xlu0 %v2922_v43 }
 0x416   :  { %v1256_v46 = vpop.xlane.xlu0 %1255 }
 0x417   :  { %v1318_v36 = vsub.f32 %v2799_v4, %v1256_v46 }
 0x419   :  { %v1351_v48 = vmul.f32 1.442695, %v1318_v36 }
 0x41a   :  { %v1254_v31 = vpop.xlane.xlu0 %1253 }
 0x41b   :  { %1982 = vpow2.f32 %v1351_v48  ;;  %v1317_v41 = vsub.f32 %v2803_v5, %v1254_v31 }
 0x41d   :  { %v1349_v39 = vmul.f32 1.442695, %v1317_v41 }
 0x41e   :  { %v1260_v52 = vpop.xlane.xlu1 %1259 }
 0x41f   :  { %1984 = vpow2.f32 %v1349_v39  ;;  %v1320_v53 = vsub.f32 %v2807_v47, %v1260_v52 }
 0x421   :  { %v1355_v55 = vmul.f32 1.442695, %v1320_v53 }
 0x422   :  { %v1258_v42 = vpop.xlane.xlu1 %1257 }
 0x423   :  { %1986 = vpow2.f32 %v1355_v55  ;;  %v1319_v57 = vsub.f32 %v2811_v49, %v1258_v42 }
 0x425   :  { %v2930_v59 = vpop.eup %1982  ;;  %v1353_v61 = vmul.f32 1.442695, %v1319_v57 }
 0x426   :  { %1415 = vadd.xlane.f32.xlu1 %v2930_v59  ;;  %v1264_v4 = vpop.xlane.xlu1 %1263 }
 0x427   :  { %1988 = vpow2.f32 %v1353_v61  ;;  %v1322_v63 = vsub.f32 %v2815_v50, %v1264_v4  ;;  %v1262_v5 = vpop.xlane.xlu0 %1261 }
 0x428   :  { %v1321_v1 = vsub.f32 %v2818_v45, %v1262_v5 }
 0x429   :  { %v2935_v3 = vpop.eup %1984  ;;  %v1359_v47 = vmul.f32 1.442695, %v1322_v63 }
 0x42a   :  { %v1357_v7 = vmul.f32 1.442695, %v1321_v1  ;;  %1413 = vadd.xlane.f32.xlu0 %v2935_v3 }
 0x42b   :  { %1990 = vpow2.f32 %v1359_v47 }
 0x42c   :  { %1992 = vpow2.f32 %v1357_v7 }
 0x42d   :  { %v2938_v49 = vpop.eup %1986 }
 0x42e   :  { %1419 = vadd.xlane.f32.xlu1 %v2938_v49  ;;  %v1268_v40 = vpop.xlane.xlu1 %1267 }
 0x42f   :  { %v1324_v10 = vsub.f32 %v2823_v44, %v1268_v40  ;;  %v1266_v12 = vpop.xlane.xlu0 %1265 }
 0x430   :  { %v1323_v50 = vsub.f32 %v2826_v51, %v1266_v12 }
 0x431   :  { %v2943_v14 = vpop.eup %1988  ;;  %v1363_v45 = vmul.f32 1.442695, %v1324_v10 }
 0x432   :  { %v1361_v16 = vmul.f32 1.442695, %v1323_v50  ;;  %1417 = vadd.xlane.f32.xlu0 %v2943_v14 }
 0x433   :  { %1994 = vpow2.f32 %v1363_v45 }
 0x434   :  { %1996 = vpow2.f32 %v1361_v16 }
 0x435   :  { %v2946_v18 = vpop.eup %1990 }
 0x436   :  { %v2948_v20 = vpop.eup %1992  ;;  %1423 = vadd.xlane.f32.xlu1 %v2946_v18  ;;  %v1272_v22 = vpop.xlane.xlu1 %1271 }
 0x437   :  { %v1326_v44 = vsub.f32 %v2831_v54, %v1272_v22  ;;  %1421 = vadd.xlane.f32.xlu0 %v2948_v20  ;;  %v1270_v51 = vpop.xlane.xlu0 %1269 }
 0x438   :  { %v1325_v25 = vsub.f32 %v2834_v56, %v1270_v51 }
 0x439   :  { %v1367_v27 = vmul.f32 1.442695, %v1326_v44 }
 0x43a   :  { %v1365_v24 = vmul.f32 1.442695, %v1325_v25 }
 0x43b   :  { %1998 = vpow2.f32 %v1367_v27 }
 0x43c   :  { %2000 = vpow2.f32 %v1365_v24 }
 0x43d   :  { %v2954_v30 = vpop.eup %1994 }
 0x43e   :  { %v2956_v32 = vpop.eup %1996  ;;  %1427 = vadd.xlane.f32.xlu1 %v2954_v30  ;;  %v1276_v35 = vpop.xlane.xlu1 %1275 }
 0x43f   :  { %v1328_v38 = vsub.f32 %v2839_v58, %v1276_v35  ;;  %1425 = vadd.xlane.f32.xlu0 %v2956_v32  ;;  %v1274_v54 = vpop.xlane.xlu0 %1273 }
 0x440   :  { %v1327_v46 = vsub.f32 %v2842_v60, %v1274_v54 }
 0x441   :  { %v1371_v36 = vmul.f32 1.442695, %v1328_v38 }
 0x442   :  { %v1369_v56 = vmul.f32 1.442695, %v1327_v46 }
 0x443   :  { %2002 = vpow2.f32 %v1371_v36 }
 0x444   :  { %2004 = vpow2.f32 %v1369_v56 }
 0x445   :  { %v2962_v48 = vpop.eup %1998 }
 0x446   :  { %v2964_v31 = vpop.eup %2000  ;;  %1431 = vadd.xlane.f32.xlu1 %v2962_v48  ;;  %v1280_v41 = vpop.xlane.xlu1 %1279 }
 0x447   :  { %v1330_v39 = vsub.f32 %v2847_v62, %v1280_v41  ;;  %1429 = vadd.xlane.f32.xlu0 %v2964_v31  ;;  %v1278_v58 = vpop.xlane.xlu0 %1277 }
 0x448   :  { %v1329_v52 = vsub.f32 %v2850_v0, %v1278_v58 }
 0x449   :  { %v1375_v53 = vmul.f32 1.442695, %v1330_v39 }
 0x44a   :  { %v1373_v60 = vmul.f32 1.442695, %v1329_v52 }
 0x44b   :  { %2006 = vpow2.f32 %v1375_v53 }
 0x44c   :  { %2008 = vpow2.f32 %v1373_v60 }
 0x44d   :  { %v2970_v55 = vpop.eup %2002 }
 0x44e   :  { %v2972_v42 = vpop.eup %2004  ;;  %1435 = vadd.xlane.f32.xlu1 %v2970_v55  ;;  %v1284_v57 = vpop.xlane.xlu1 %1283 }
 0x44f   :  { %v1332_v61 = vsub.f32 %v2855_v2, %v1284_v57  ;;  %1433 = vadd.xlane.f32.xlu0 %v2972_v42  ;;  %v1282_v62 = vpop.xlane.xlu0 %1281 }
 0x450   :  { %v1331_v4 = vsub.f32 %v2858_v6, %v1282_v62 }
 0x451   :  { %v1379_v63 = vmul.f32 1.442695, %v1332_v61 }
 0x452   :  { %v1377_v0 = vmul.f32 1.442695, %v1331_v4 }
 0x453   :  { %2010 = vpow2.f32 %v1379_v63 }
 0x454   :  { %2012 = vpow2.f32 %v1377_v0 }
 0x455   :  { %v2978_v5 = vpop.eup %2006 }
 0x456   :  { %v2980_v1 = vpop.eup %2008  ;;  %1439 = vadd.xlane.f32.xlu1 %v2978_v5  ;;  %v1288_v47 = vpop.xlane.xlu1 %1287 }
 0x457   :  { %v1334_v7 = vsub.f32 %v2863_v8, %v1288_v47  ;;  %1437 = vadd.xlane.f32.xlu0 %v2980_v1  ;;  %v1286_v2 = vpop.xlane.xlu0 %1285 }
 0x458   :  { %v1333_v40 = vsub.f32 %v2866_v9, %v1286_v2 }
 0x459   :  { %v1383_v10 = vmul.f32 1.442695, %v1334_v7 }
 0x45a   :  { %v1381_v6 = vmul.f32 1.442695, %v1333_v40 }
 0x45b   :  { %2014 = vpow2.f32 %v1383_v10 }
 0x45c   :  { %2016 = vpow2.f32 %v1381_v6 }
 0x45d   :  { %v2986_v12 = vpop.eup %2010 }
 0x45e   :  { %v2988_v50 = vpop.eup %2012  ;;  %1443 = vadd.xlane.f32.xlu1 %v2986_v12  ;;  %v1292_v45 = vpop.xlane.xlu1 %1291 }
 0x45f   :  { %v1336_v16 = vsub.f32 %v2871_v11, %v1292_v45  ;;  %1441 = vadd.xlane.f32.xlu0 %v2988_v50  ;;  %v1290_v8 = vpop.xlane.xlu0 %1289 }
 0x460   :  { %v1335_v22 = vsub.f32 %v2874_v13, %v1290_v8 }
 0x461   :  { %v1387_v44 = vmul.f32 1.442695, %v1336_v16 }
 0x462   :  { %v1385_v9 = vmul.f32 1.442695, %v1335_v22 }
 0x463   :  { %2018 = vpow2.f32 %v1387_v44 }
 0x464   :  { %2020 = vpow2.f32 %v1385_v9 }
 0x465   :  { %v2994_v51 = vpop.eup %2014 }
 0x466   :  { %v2996_v25 = vpop.eup %2016  ;;  %1447 = vadd.xlane.f32.xlu1 %v2994_v51  ;;  %v1296_v27 = vpop.xlane.xlu1 %1295 }
 0x467   :  { %v1338_v24 = vsub.f32 %v2879_v15, %v1296_v27  ;;  %1445 = vadd.xlane.f32.xlu0 %v2996_v25  ;;  %v1294_v11 = vpop.xlane.xlu0 %1293 }
 0x468   :  { %v1337_v35 = vsub.f32 %v2882_v17, %v1294_v11 }
 0x469   :  { %v1391_v38 = vmul.f32 1.442695, %v1338_v24 }
 0x46a   :  { %v1389_v13 = vmul.f32 1.442695, %v1337_v35 }
 0x46b   :  { %2022 = vpow2.f32 %v1391_v38 }
 0x46c   :  { %2024 = vpow2.f32 %v1389_v13 }
 0x46d   :  { %v3002_v54 = vpop.eup %2018 }
 0x46e   :  { %v3004_v46 = vpop.eup %2020  ;;  %1451 = vadd.xlane.f32.xlu1 %v3002_v54  ;;  %v1300_v36 = vpop.xlane.xlu1 %1299 }
 0x46f   :  { %v1340_v56 = vsub.f32 %v2887_v19, %v1300_v36  ;;  %1449 = vadd.xlane.f32.xlu0 %v3004_v46  ;;  %v1298_v15 = vpop.xlane.xlu0 %1297 }
 0x470   :  { %v1339_v41 = vsub.f32 %v2890_v21, %v1298_v15 }
 0x471   :  { %v1395_v39 = vmul.f32 1.442695, %v1340_v56 }
 0x472   :  { %v1393_v17 = vmul.f32 1.442695, %v1339_v41 }
 0x473   :  { %2026 = vpow2.f32 %v1395_v39 }
 0x474   :  { %2028 = vpow2.f32 %v1393_v17 }
 0x475   :  { %v3010_v58 = vpop.eup %2022 }
 0x476   :  { %v3012_v52 = vpop.eup %2024  ;;  %1455 = vadd.xlane.f32.xlu1 %v3010_v58  ;;  %v1304_v53 = vpop.xlane.xlu1 %1303 }
 0x477   :  { %v1342_v60 = vsub.f32 %v2895_v23, %v1304_v53  ;;  %1453 = vadd.xlane.f32.xlu0 %v3012_v52  ;;  %v1302_v19 = vpop.xlane.xlu0 %1301 }
 0x478   :  { %v1341_v57 = vsub.f32 %v2898_v26, %v1302_v19 }
 0x479   :  { %v1399_v61 = vmul.f32 1.442695, %v1342_v60 }
 0x47a   :  { %v1397_v21 = vmul.f32 1.442695, %v1341_v57 }
 0x47b   :  { %2030 = vpow2.f32 %v1399_v61 }
 0x47c   :  { %2032 = vpow2.f32 %v1397_v21 }
 0x47d   :  { %v3018_v62 = vpop.eup %2026 }
 0x47e   :  { %v3020_v4 = vpop.eup %2028  ;;  %1459 = vadd.xlane.f32.xlu1 %v3018_v62  ;;  %v1308_v63 = vpop.xlane.xlu1 %1307 }
 0x47f   :  { %v1344_v0 = vsub.f32 %v2903_v28, %v1308_v63  ;;  %1457 = vadd.xlane.f32.xlu0 %v3020_v4  ;;  %v1306_v23 = vpop.xlane.xlu0 %1305 }
 0x480   :  { %v1343_v47 = vsub.f32 %v2906_v29, %v1306_v23 }
 0x481   :  { %v1403_v7 = vmul.f32 1.442695, %v1344_v0 }
 0x482   :  { %v1401_v26 = vmul.f32 1.442695, %v1343_v47 }
 0x483   :  { %2034 = vpow2.f32 %v1403_v7 }
 0x484   :  { %2036 = vpow2.f32 %v1401_v26 }
 0x485   :  { %v3026_v2 = vpop.eup %2030 }
 0x486   :  { %v3028_v40 = vpop.eup %2032  ;;  %1463 = vadd.xlane.f32.xlu1 %v3026_v2  ;;  %v1312_v10 = vpop.xlane.xlu1 %1311 }
 0x487   :  { %v1346_v6 = vsub.f32 %v2911_v33, %v1312_v10  ;;  %1461 = vadd.xlane.f32.xlu0 %v3028_v40  ;;  %v1310_v28 = vpop.xlane.xlu0 %1309 }
 0x488   :  { %v1345_v45 = vsub.f32 %v2914_v34, %v1310_v28 }
 0x489   :  { %v1407_v16 = vmul.f32 1.442695, %v1346_v6 }
 0x48a   :  { %v1405_v29 = vmul.f32 1.442695, %v1345_v45 }
 0x48b   :  { %2038 = vpow2.f32 %v1407_v16 }
 0x48c   :  { %2040 = vpow2.f32 %v1405_v29 }
 0x48d   :  { %v3034_v8 = vpop.eup %2034 }
 0x48e   :  { %v3036_v22 = vpop.eup %2036  ;;  %1467 = vadd.xlane.f32.xlu1 %v3034_v8  ;;  %v1316_v44 = vpop.xlane.xlu1 %1315 }
 0x48f   :  { %v1348_v9 = vsub.f32 %v2919_v37, %v1316_v44  ;;  %1465 = vadd.xlane.f32.xlu0 %v3036_v22  ;;  %v1314_v33 = vpop.xlane.xlu0 %1313 }
 0x490   :  { %v1347_v27 = vsub.f32 %v2922_v43, %v1314_v33 }
 0x491   :  { %v1411_v24 = vmul.f32 1.442695, %v1348_v9 }
 0x492   :  { %v1409_v34 = vmul.f32 1.442695, %v1347_v27 }
 0x493   :  { %2042 = vpow2.f32 %v1411_v24 }
 0x494   :  { %2044 = vpow2.f32 %v1409_v34 }
 0x495   :  { %v3042_v11 = vpop.eup %2038 }
 0x496   :  { %v3044_v35 = vpop.eup %2040  ;;  %1471 = vadd.xlane.f32.xlu1 %v3042_v11 }
 0x497   :  { %1469 = vadd.xlane.f32.xlu0 %v3044_v35 }
 0x49d   :  { %v3048_v38 = vpop.eup %2042 }
 0x49e   :  { %v3050_v37 = vpop.eup %2044  ;;  %1475 = vadd.xlane.f32.xlu1 %v3048_v38 }
 0x49f   :  { %1473 = vadd.xlane.f32.xlu0 %v3050_v37 }
 0x4b3   :  { %v1416_v43 = vpop.xlane.xlu1 %1415 }
 0x4b4   :  { %2046 = vrcp.f32 %v1416_v43 }
 0x4b7   :  { %v1414_v13 = vpop.xlane.xlu0 %1413 }
 0x4b8   :  { %2048 = vrcp.f32 %v1414_v13 }
 0x4bb   :  { %v1420_v36 = vpop.xlane.xlu1 %1419 }
 0x4bc   :  { %2050 = vrcp.f32 %v1420_v36 }
 0x4be   :  { %v2047_v56 = vpop.eup %2046 }
 0x4bf   :  { %v1510_v15 = vmul.f32 %v2047_v56, %v2930_v59  ;;  %v1418_v41 = vpop.xlane.xlu0 %1417 }
 0x4c0   :  { %2052 = vrcp.f32 %v1418_v41 }
 0x4c1   :  { %1542 = vst [vmem:[%s3191_s9 + $0x8] sm:$0xff] %v1510_v15 }
 0x4c2   :  { %v2049_v39 = vpop.eup %2048 }
 0x4c3   :  { %v1509_v17 = vmul.f32 %v2049_v39, %v2935_v3  ;;  %v1424_v53 = vpop.xlane.xlu1 %1423 }
 0x4c4   :  { %2054 = vrcp.f32 %v1424_v53  ;;  %v1422_v60 = vpop.xlane.xlu0 %1421 }
 0x4c5   :  { %1541 = vst [vmem:[%s3191_s9] sm:$0xff] %v1509_v17  ;;  %2056 = vrcp.f32 %v1422_v60 }
 0x4c6   :  { %v2051_v19 = vpop.eup %2050 }
 0x4c7   :  { %v1512_v59 = vmul.f32 %v2051_v19, %v2938_v49 }
 0x4c9   :  { %1544 = vst [vmem:[%s3191_s9 + $0x18] sm:$0xff] %v1512_v59 }
 0x4ca   :  { %v2053_v57 = vpop.eup %2052 }
 0x4cb   :  { %v1511_v61 = vmul.f32 %v2053_v57, %v2943_v14  ;;  %v1428_v21 = vpop.xlane.xlu1 %1427 }
 0x4cc   :  { %2058 = vrcp.f32 %v1428_v21  ;;  %v1426_v3 = vpop.xlane.xlu0 %1425 }
 0x4cd   :  { %1543 = vst [vmem:[%s3191_s9 + $0x10] sm:$0xff] %v1511_v61  ;;  %2060 = vrcp.f32 %v1426_v3 }
 0x4ce   :  { %v2055_v63 = vpop.eup %2054 }
 0x4cf   :  { %v2057_v0 = vpop.eup %2056  ;;  %v1514_v23 = vmul.f32 %v2055_v63, %v2946_v18 }
 0x4d0   :  { %v1513_v49 = vmul.f32 %v2057_v0, %v2948_v20 }
 0x4d1   :  { %1546 = vst [vmem:[%s3191_s9 + $0x28] sm:$0xff] %v1514_v23 }
 0x4d2   :  { %1545 = vst [vmem:[%s3191_s9 + $0x20] sm:$0xff] %v1513_v49 }
 0x4d3   :  { %v1432_v14 = vpop.xlane.xlu1 %1431 }
 0x4d4   :  { %2062 = vrcp.f32 %v1432_v14  ;;  %v1430_v47 = vpop.xlane.xlu0 %1429 }
 0x4d5   :  { %2064 = vrcp.f32 %v1430_v47 }
 0x4d6   :  { %v2059_v7 = vpop.eup %2058 }
 0x4d7   :  { %v2061_v26 = vpop.eup %2060  ;;  %v1516_v10 = vmul.f32 %v2059_v7, %v2954_v30 }
 0x4d8   :  { %v1515_v18 = vmul.f32 %v2061_v26, %v2956_v32 }
 0x4d9   :  { %1548 = vst [vmem:[%s3191_s9 + $0x38] sm:$0xff] %v1516_v10 }
 0x4da   :  { %1547 = vst [vmem:[%s3191_s9 + $0x30] sm:$0xff] %v1515_v18 }
 0x4db   :  { %v1436_v20 = vpop.xlane.xlu1 %1435 }
 0x4dc   :  { %2066 = vrcp.f32 %v1436_v20  ;;  %v1434_v6 = vpop.xlane.xlu0 %1433 }
 0x4dd   :  { %2068 = vrcp.f32 %v1434_v6 }
 0x4de   :  { %v2063_v28 = vpop.eup %2062 }
 0x4df   :  { %v2065_v45 = vpop.eup %2064  ;;  %v1518_v16 = vmul.f32 %v2063_v28, %v2962_v48 }
 0x4e0   :  { %v1517_v30 = vmul.f32 %v2065_v45, %v2964_v31 }
 0x4e1   :  { %1550 = vst [vmem:[%s3191_s9 + $0x48] sm:$0xff] %v1518_v16 }
 0x4e2   :  { %1549 = vst [vmem:[%s3191_s9 + $0x40] sm:$0xff] %v1517_v30 }
 0x4e3   :  { %v1440_v32 = vpop.xlane.xlu1 %1439 }
 0x4e4   :  { %2070 = vrcp.f32 %v1440_v32  ;;  %v1438_v29 = vpop.xlane.xlu0 %1437 }
 0x4e5   :  { %2072 = vrcp.f32 %v1438_v29 }
 0x4e6   :  { %v2067_v44 = vpop.eup %2066 }
 0x4e7   :  { %v2069_v9 = vpop.eup %2068  ;;  %v1520_v33 = vmul.f32 %v2067_v44, %v2970_v55 }
 0x4e8   :  { %v1519_v48 = vmul.f32 %v2069_v9, %v2972_v42 }
 0x4e9   :  { %1552 = vst [vmem:[%s3191_s9 + $0x58] sm:$0xff] %v1520_v33 }
 0x4ea   :  { %1551 = vst [vmem:[%s3191_s9 + $0x50] sm:$0xff] %v1519_v48 }
 0x4eb   :  { %v1444_v31 = vpop.xlane.xlu1 %1443 }
 0x4ec   :  { %2074 = vrcp.f32 %v1444_v31  ;;  %v1442_v27 = vpop.xlane.xlu0 %1441 }
 0x4ed   :  { %2076 = vrcp.f32 %v1442_v27 }
 0x4ee   :  { %v2071_v24 = vpop.eup %2070 }
 0x4ef   :  { %v2073_v34 = vpop.eup %2072  ;;  %v1522_v43 = vmul.f32 %v2071_v24, %v2978_v5 }
 0x4f0   :  { %v1521_v55 = vmul.f32 %v2073_v34, %v2980_v1 }
 0x4f1   :  { %1554 = vst [vmem:[%s3191_s9 + $0x68] sm:$0xff] %v1522_v43 }
 0x4f2   :  { %1553 = vst [vmem:[%s3191_s9 + $0x60] sm:$0xff] %v1521_v55 }
 0x4f3   :  { %v1448_v42 = vpop.xlane.xlu1 %1447 }
 0x4f4   :  { %2078 = vrcp.f32 %v1448_v42  ;;  %v1446_v13 = vpop.xlane.xlu0 %1445 }
 0x4f5   :  { %2080 = vrcp.f32 %v1446_v13 }
 0x4f6   :  { %v2075_v36 = vpop.eup %2074 }
 0x4f7   :  { %v2077_v56 = vpop.eup %2076  ;;  %v1524_v15 = vmul.f32 %v2075_v36, %v2986_v12 }
 0x4f8   :  { %v1523_v5 = vmul.f32 %v2077_v56, %v2988_v50 }
 0x4f9   :  { %1556 = vst [vmem:[%s3191_s9 + $0x78] sm:$0xff] %v1524_v15 }
 0x4fa   :  { %1555 = vst [vmem:[%s3191_s9 + $0x70] sm:$0xff] %v1523_v5 }
 0x4fb   :  { %v1452_v1 = vpop.xlane.xlu1 %1451 }
 0x4fc   :  { %2082 = vrcp.f32 %v1452_v1  ;;  %v1450_v41 = vpop.xlane.xlu0 %1449 }
 0x4fd   :  { %2084 = vrcp.f32 %v1450_v41 }
 0x4fe   :  { %v2079_v39 = vpop.eup %2078 }
 0x4ff   :  { %v2081_v17 = vpop.eup %2080  ;;  %v1526_v53 = vmul.f32 %v2079_v39, %v2994_v51 }
 0x500   :  { %v1525_v12 = vmul.f32 %v2081_v17, %v2996_v25 }
 0x501   :  { %1558 = vst [vmem:[%s3191_s9 + $0x88] sm:$0xff] %v1526_v53 }
 0x502   :  { %1557 = vst [vmem:[%s3191_s9 + $0x80] sm:$0xff] %v1525_v12 }
 0x503   :  { %v1456_v50 = vpop.xlane.xlu1 %1455 }
 0x504   :  { %2086 = vrcp.f32 %v1456_v50  ;;  %v1454_v60 = vpop.xlane.xlu0 %1453 }
 0x505   :  { %2088 = vrcp.f32 %v1454_v60 }
 0x506   :  { %v2083_v19 = vpop.eup %2082 }
 0x507   :  { %v2085_v59 = vpop.eup %2084  ;;  %v1528_v57 = vmul.f32 %v2083_v19, %v3002_v54 }
 0x508   :  { %v1527_v51 = vmul.f32 %v2085_v59, %v3004_v46 }
 0x509   :  { %1560 = vst [vmem:[%s3191_s9 + $0x98] sm:$0xff] %v1528_v57 }
 0x50a   :  { %1559 = vst [vmem:[%s3191_s9 + $0x90] sm:$0xff] %v1527_v51 }
 0x50b   :  { %v1460_v25 = vpop.xlane.xlu1 %1459 }
 0x50c   :  { %2090 = vrcp.f32 %v1460_v25  ;;  %v1458_v61 = vpop.xlane.xlu0 %1457 }
 0x50d   :  { %2092 = vrcp.f32 %v1458_v61 }
 0x50e   :  { %v2087_v21 = vpop.eup %2086 }
 0x50f   :  { %v2089_v3 = vpop.eup %2088  ;;  %v1530_v63 = vmul.f32 %v2087_v21, %v3010_v58 }
 0x510   :  { %v1529_v54 = vmul.f32 %v2089_v3, %v3012_v52 }
 0x511   :  { %1562 = vst [vmem:[%s3191_s9 + $0xa8] sm:$0xff] %v1530_v63 }
 0x512   :  { %1561 = vst [vmem:[%s3191_s9 + $0xa0] sm:$0xff] %v1529_v54 }
 0x513   :  { %v1464_v46 = vpop.xlane.xlu1 %1463 }
 0x514   :  { %2094 = vrcp.f32 %v1464_v46  ;;  %v1462_v0 = vpop.xlane.xlu0 %1461 }
 0x515   :  { %2096 = vrcp.f32 %v1462_v0 }
 0x516   :  { %v2091_v23 = vpop.eup %2090 }
 0x517   :  { %v2093_v49 = vpop.eup %2092  ;;  %v1532_v14 = vmul.f32 %v2091_v23, %v3018_v62 }
 0x518   :  { %v1531_v58 = vmul.f32 %v2093_v49, %v3020_v4 }
 0x519   :  { %1564 = vst [vmem:[%s3191_s9 + $0xb8] sm:$0xff] %v1532_v14 }
 0x51a   :  { %1563 = vst [vmem:[%s3191_s9 + $0xb0] sm:$0xff] %v1531_v58 }
 0x51b   :  { %v1468_v52 = vpop.xlane.xlu1 %1467 }
 0x51c   :  { %2098 = vrcp.f32 %v1468_v52  ;;  %v1466_v47 = vpop.xlane.xlu0 %1465 }
 0x51d   :  { %2100 = vrcp.f32 %v1466_v47 }
 0x51e   :  { %v2095_v7 = vpop.eup %2094 }
 0x51f   :  { %v2097_v26 = vpop.eup %2096  ;;  %v1534_v10 = vmul.f32 %v2095_v7, %v3026_v2 }
 0x520   :  { %v1533_v62 = vmul.f32 %v2097_v26, %v3028_v40 }
 0x521   :  { %1566 = vst [vmem:[%s3191_s9 + $0xc8] sm:$0xff] %v1534_v10 }
 0x522   :  { %1565 = vst [vmem:[%s3191_s9 + $0xc0] sm:$0xff] %v1533_v62 }
 0x523   :  { %v1472_v4 = vpop.xlane.xlu1 %1471 }
 0x524   :  { %2102 = vrcp.f32 %v1472_v4  ;;  %v1470_v18 = vpop.xlane.xlu0 %1469 }
 0x525   :  { %2104 = vrcp.f32 %v1470_v18 }
 0x526   :  { %v2099_v20 = vpop.eup %2098 }
 0x527   :  { %v2101_v6 = vpop.eup %2100  ;;  %v1536_v28 = vmul.f32 %v2099_v20, %v3034_v8 }
 0x528   :  { %v1535_v2 = vmul.f32 %v2101_v6, %v3036_v22 }
 0x529   :  { %1568 = vst [vmem:[%s3191_s9 + $0xd8] sm:$0xff] %v1536_v28 }
 0x52a   :  { %1567 = vst [vmem:[%s3191_s9 + $0xd0] sm:$0xff] %v1535_v2 }
 0x52b   :  { %v1476_v40 = vpop.xlane.xlu1 %1475 }
 0x52c   :  { %2106 = vrcp.f32 %v1476_v40  ;;  %v1474_v45 = vpop.xlane.xlu0 %1473 }
 0x52d   :  { %2108 = vrcp.f32 %v1474_v45 }
 0x52e   :  { %v2103_v16 = vpop.eup %2102 }
 0x52f   :  { %v2105_v30 = vpop.eup %2104  ;;  %v1538_v32 = vmul.f32 %v2103_v16, %v3042_v11 }
 0x530   :  { %v1537_v8 = vmul.f32 %v2105_v30, %v3044_v35 }
 0x531   :  { %1570 = vst [vmem:[%s3191_s9 + $0xe8] sm:$0xff] %v1538_v32 }
 0x532   :  { %1569 = vst [vmem:[%s3191_s9 + $0xe0] sm:$0xff] %v1537_v8 }
 0x536   :  { %v2107_v22 = vpop.eup %2106 }
 0x537   :  { %v2109_v29 = vpop.eup %2108  ;;  %v1540_v44 = vmul.f32 %v2107_v22, %v3048_v38 }
 0x538   :  { %v1539_v9 = vmul.f32 %v2109_v29, %v3050_v37 }
 0x539   :  { %1572 = vst [vmem:[%s3191_s9 + $0xf8] sm:$0xff] %v1540_v44 }
 0x53a   :  { %1571 = vst [vmem:[%s3191_s9 + $0xf0] sm:$0xff] %v1539_v9 }

</bundles_post_ra>
